<compile_context>
chip_gen: v7x
topology: tpu7x:2x2x1
jax: 0.10.0
libtpu: 0.0.40
codegen_flags: <defaults>
</compile_context>

<pallas_src>
import jax
import jax.numpy as jnp
from jax.experimental import pallas as pl
from jax.experimental.pallas import tpu as pltpu

# ---- problem sizes (small, consistent with the module's forward) ------------
B, CIN, H, W = 2, 4, 16, 16          # input x: (B, 4, H, W)  NCHW
HW = H * W
L = B * HW                           # batch folded into the lane axis (512)
C_SEG_HID = 16                       # segmentation hidden channels
C_CLS_HID = 16                       # classification hidden channels
NUM_CLASSES_SEG = 1
NUM_CLASSES_CLS = 4
MASK_WEIGHT = 0.5                    # mask_method='feature_weighting'
KPAD = 80                            # 9 taps * 8 (sublane-aligned) + 8-row bias block

# flat lane shift of conv tap (dy, dx)
_SHIFTS = tuple((dy - 1) * W + (dx - 1) for dy in range(3) for dx in range(3))


# ------------------------------ Pallas kernel --------------------------------
def combined_kernel(x_ref, taps_ref, params_ref, sel_ref, segmask_ref, cls_ref):
    x8 = x_ref[...]                    # (8, L)  rows 0-2 = RGB, rows 3-7 = 0
    taps = taps_ref[...]               # (80, L) per-tap validity mask + bias row
    P = params_ref[...]                # (40, 80) packed weights/biases
    sel = sel_ref[...]                 # (L, B)  per-image GAP selector (1/HW entries)

    # ---- shared im2col: 9 lane-rolls of the 8-row slab + constant bias block ----
    raw = []
    for s in _SHIFTS:
        raw.append(x8 if s == 0 else pltpu.roll(x8, (-s) % L, axis=1))
    raw.append(jnp.ones_like(x8))                        # bias block (row 72 survives mask)
    p1 = jnp.concatenate(raw, axis=0) * taps             # (80, L) one full-tile mask multiply

    # ---- segmentation: conv3x3(SAME) (bias folded, one K=80 pass) + ReLU + conv1x1 ----
    h1 = jnp.maximum(
        jnp.dot(P[0:16, :], p1, preferred_element_type=jnp.float32), 0.0)   # (16, L)
    seg = (jnp.dot(P[32:33, 0:16], h1, preferred_element_type=jnp.float32)
           + P[32:33, 16:17])                                               # (1, L)

    # sigmoid (exp on EUP).  approx=True reciprocal was considered (review) but kept
    # exact so the 1e-4 correctness tolerance is safely preserved.
    m = pl.reciprocal(1.0 + jnp.exp(-seg))                                  # (1, L)
    segmask_ref[...] = jnp.concatenate([seg, m], axis=0)                    # (2, L)

    # ---- feature_weighting + im2col reuse --------------------------------------
    # weighted = x * scale  =>  masked tap-k block of weighted == p1 block k * roll_k(scale)
    scale = 1.0 + MASK_WEIGHT * m                                           # (1, L)
    blocks2 = []
    for k, s in enumerate(_SHIFTS):
        sr = scale if s == 0 else pltpu.roll(scale, (-s) % L, axis=1)
        blocks2.append(p1[8 * k:8 * (k + 1), :] * sr)                       # (8, L) broadcast
    blocks2.append(p1[72:80, :])                                            # bias block un-scaled
    p2 = jnp.concatenate(blocks2, axis=0)                                   # (80, L)

    # ---- classification: conv3x3 + ReLU + per-image GAP (MXU) + linear ----------
    h2 = jnp.maximum(
        jnp.dot(P[16:32, :], p2, preferred_element_type=jnp.float32), 0.0)  # (16, L)
    pooled = jnp.dot(h2, sel, preferred_element_type=jnp.float32)           # (16, B)
    cls = (jnp.dot(P[33:37, 0:16], pooled, preferred_element_type=jnp.float32)
           + P[33:37, 16:17])                                               # (4, B)
    cls_ref[...] = cls


# ------------------ host-side constant / parameter packing --------------------
def _make_taps():
    """(80, L) mask: rows 8k+0..2 = validity of tap k (tiled over batch), row 72 = ones."""
    pos = jnp.arange(HW, dtype=jnp.int32)
    y, xx = pos // W, pos % W
    zero5 = jnp.zeros((5, L), jnp.float32)
    blocks = []
    for dy in range(3):
        for dx in range(3):
            valid = ((y + dy - 1 >= 0) & (y + dy - 1 < H) &
                     (xx + dx - 1 >= 0) & (xx + dx - 1 < W)).astype(jnp.float32)
            v = jnp.tile(valid, (B,))[None, :]                 # (1, L) batch-major lanes
            blocks.append(jnp.concatenate([jnp.broadcast_to(v, (3, L)), zero5], axis=0))
    bias_block = jnp.concatenate(
        [jnp.ones((1, L), jnp.float32), jnp.zeros((7, L), jnp.float32)], axis=0)
    blocks.append(bias_block)
    return jnp.concatenate(blocks, axis=0)                     # (80, L)


def _make_sel():
    """(L, B) selector: 1/HW where lane belongs to image b, else 0 (GAP on the MXU)."""
    lane_img = jnp.arange(L, dtype=jnp.int32)[:, None] // HW
    img_ids = jnp.arange(B, dtype=jnp.int32)[None, :]
    return (lane_img == img_ids).astype(jnp.float32) / float(HW)


def _pack_conv(w, b):
    """(co,3,3,3) weight + (co,) bias -> (co, 80): cols 8k+c = w[:,ky,kx,c], col 72 = bias."""
    co = w.shape[0]
    w9 = w.reshape(co, 9, 3)
    w9 = jnp.pad(w9, ((0, 0), (0, 0), (0, 5)))                 # (co, 9, 8)
    w72 = w9.reshape(co, 72)
    bias_cols = jnp.concatenate([b.reshape(co, 1), jnp.zeros((co, 7), jnp.float32)], axis=1)
    return jnp.concatenate([w72, bias_cols], axis=1)           # (co, 80)


def _pack_params(params):
    w1s, b1s, w2s, b2s, w1c, b1c, wfc, bfc = params
    head = jnp.zeros((8, KPAD), jnp.float32)
    head = head.at[0, 0:C_SEG_HID].set(w2s[0])
    head = head.at[0, C_SEG_HID].set(b2s[0])
    head = head.at[1:1 + NUM_CLASSES_CLS, 0:C_CLS_HID].set(wfc)
    head = head.at[1:1 + NUM_CLASSES_CLS, C_CLS_HID].set(bfc)
    return jnp.concatenate([_pack_conv(w1s, b1s), _pack_conv(w1c, b1c), head], axis=0)  # (40,80)


# ------------------------------ wrapper ---------------------------------------
@jax.jit
def combined_forward(x_nchw, params):
    # rgb = x[:, :3]; fold batch into lanes -> (3, B*HW); pad channels to 8 sublanes
    rgb = jnp.transpose(x_nchw[:, :3, :, :].reshape(B, 3, HW), (1, 0, 2)).reshape(3, L)
    x8 = jnp.concatenate([rgb, jnp.zeros((5, L), rgb.dtype)], axis=0)

    taps = _make_taps()
    sel = _make_sel()
    pslab = _pack_params(params)

    segmask, cls_tb = pl.pallas_call(
        combined_kernel,
        out_shape=(
            jax.ShapeDtypeStruct((2, L), jnp.float32),                 # row0 = seg, row1 = mask
            jax.ShapeDtypeStruct((NUM_CLASSES_CLS, B), jnp.float32),   # cls (classes x batch)
        ),
        grid_spec=pltpu.PrefetchScalarGridSpec(
            num_scalar_prefetch=0,
            grid=(1,),                                                 # single folded-batch step
            in_specs=[
                pl.BlockSpec((8, L), lambda i: (0, 0)),
                pl.BlockSpec((KPAD, L), lambda i: (0, 0)),
                pl.BlockSpec((40, KPAD), lambda i: (0, 0)),
                pl.BlockSpec((L, B), lambda i: (0, 0)),
            ],
            out_specs=(
                pl.BlockSpec((2, L), lambda i: (0, 0)),
                pl.BlockSpec((NUM_CLASSES_CLS, B), lambda i: (0, 0)),
            ),
        ),
        compiler_params=pltpu.CompilerParams(
            dimension_semantics=("arbitrary",)),
    )(x8, taps, pslab, sel)

    # back to PyTorch conventions
    seg_output = segmask[0].reshape(B, NUM_CLASSES_SEG, H, W)
    seg_mask = segmask[1].reshape(B, NUM_CLASSES_SEG, H, W)
    cls_output = jnp.transpose(cls_tb)                                 # (B, NUM_CLASSES_CLS)
    return seg_output, cls_output, seg_mask


# --------------------------- deterministic params -----------------------------
def init_params(key):
    ks = jax.random.split(key, 8)
    w1s = jax.random.normal(ks[0], (C_SEG_HID, 3, 3, 3), jnp.float32) * 0.1   # (o,ky,kx,ci)
    b1s = jax.random.normal(ks[1], (C_SEG_HID,), jnp.float32) * 0.01
    w2s = jax.random.normal(ks[2], (NUM_CLASSES_SEG, C_SEG_HID), jnp.float32) * 0.1
    b2s = jax.random.normal(ks[3], (NUM_CLASSES_SEG,), jnp.float32) * 0.01
    w1c = jax.random.normal(ks[4], (C_CLS_HID, 3, 3, 3), jnp.float32) * 0.1
    b1c = jax.random.normal(ks[5], (C_CLS_HID,), jnp.float32) * 0.01
    wfc = jax.random.normal(ks[6], (NUM_CLASSES_CLS, C_CLS_HID), jnp.float32) * 0.1
    bfc = jax.random.normal(ks[7], (NUM_CLASSES_CLS,), jnp.float32) * 0.01
    return (w1s, b1s, w2s, b2s, w1c, b1c, wfc, bfc)


# ----------------------------- pure-JAX reference ------------------------------
def reference_forward(x_nchw, params):
    w1s, b1s, w2s, b2s, w1c, b1c, wfc, bfc = params
    rgb = jnp.transpose(x_nchw[:, :3, :, :], (0, 2, 3, 1))        # NHWC

    def conv3x3(x, w_okkc, b):
        w_hwio = jnp.transpose(w_okkc, (1, 2, 3, 0))              # (ky,kx,ci,co)
        y = jax.lax.conv_general_dilated(
            x, w_hwio, (1, 1), 'SAME',
            dimension_numbers=('NHWC', 'HWIO', 'NHWC'))
        return y + b.reshape(1, 1, 1, -1)

    h1 = jnp.maximum(conv3x3(rgb, w1s, b1s), 0.0)
    seg = jnp.einsum('bhwc,oc->bhwo', h1, w2s) + b2s.reshape(1, 1, 1, -1)
    mask = jax.nn.sigmoid(seg)
    weighted = rgb * (1.0 + MASK_WEIGHT * mask)
    h2 = jnp.maximum(conv3x3(weighted, w1c, b1c), 0.0)
    pooled = jnp.mean(h2, axis=(1, 2))                            # (B, C_CLS_HID)
    cls = pooled @ wfc.T + bfc
    return (jnp.transpose(seg, (0, 3, 1, 2)),
            cls,
            jnp.transpose(mask, (0, 3, 1, 2)))


# ----------------------------------- main --------------------------------------
if __name__ == "__main__":
    key = jax.random.PRNGKey(0)
    kx, kp = jax.random.split(key)
    x = jax.random.normal(kx, (B, CIN, H, W), jnp.float32)
    params = init_params(kp)

    outs = jax.block_until_ready(combined_forward(x, params))
    refs = reference_forward(x, params)

    for got, ref in zip(outs, refs):
        assert got.shape == ref.shape, (got.shape, ref.shape)
        assert jnp.allclose(got, ref, atol=1e-4, rtol=1e-4), float(
            jnp.max(jnp.abs(got - ref)))

    print("KERNEL_OK")
</pallas_src>

<mosaic_0001>
module attributes {stable_mosaic.version = 11 : i64} {
  func.func @combined_kernel(%arg0: i32, %arg1: memref<8x512xf32, #tpu.memory_space<vmem>>, %arg2: memref<80x512xf32, #tpu.memory_space<vmem>>, %arg3: memref<40x80xf32, #tpu.memory_space<vmem>>, %arg4: memref<512x2xf32, #tpu.memory_space<vmem>>, %arg5: memref<2x512xf32, #tpu.memory_space<vmem>>, %arg6: memref<4x2xf32, #tpu.memory_space<vmem>>) attributes {dimension_semantics = [#tpu.dimension_semantics<arbitrary>], iteration_bounds = array<i64: 1>, scalar_prefetch = 0 : i64, scratch_operands = 0 : i64, tpu.core_type = #tpu.core_type<tc>, window_params = [{pipeline_mode = #tpu.pipeline_mode<synchronous>, transform_indices = @transform_0, window_bounds = array<i64: 8, 512>}, {pipeline_mode = #tpu.pipeline_mode<synchronous>, transform_indices = @transform_1, window_bounds = array<i64: 80, 512>}, {pipeline_mode = #tpu.pipeline_mode<synchronous>, transform_indices = @transform_2, window_bounds = array<i64: 40, 80>}, {pipeline_mode = #tpu.pipeline_mode<synchronous>, transform_indices = @transform_3, window_bounds = array<i64: 512, 2>}, {pipeline_mode = #tpu.pipeline_mode<synchronous>, transform_indices = @transform_4, window_bounds = array<i64: 2, 512>}, {pipeline_mode = #tpu.pipeline_mode<synchronous>, transform_indices = @transform_5, window_bounds = array<i64: 4, 2>}]} {
    %c0 = arith.constant 0 : index
    %c0_0 = arith.constant 0 : index
    %0 = vector.load %arg1[%c0, %c0_0] : memref<8x512xf32, #tpu.memory_space<vmem>>, vector<8x512xf32>
    %c0_1 = arith.constant 0 : index
    %c0_2 = arith.constant 0 : index
    %1 = vector.load %arg2[%c0_1, %c0_2] : memref<80x512xf32, #tpu.memory_space<vmem>>, vector<80x512xf32>
    %c0_3 = arith.constant 0 : index
    %c0_4 = arith.constant 0 : index
    %2 = vector.load %arg3[%c0_3, %c0_4] : memref<40x80xf32, #tpu.memory_space<vmem>>, vector<40x80xf32>
    %c0_5 = arith.constant 0 : index
    %c0_6 = arith.constant 0 : index
    %3 = vector.load %arg4[%c0_5, %c0_6] : memref<512x2xf32, #tpu.memory_space<vmem>>, vector<512x2xf32>
    %c17_i32 = arith.constant 17 : i32
    %4 = tpu.dynamic_rotate %0 by %c17_i32 dim 1 : vector<8x512xf32>, i32 -> vector<8x512xf32>
    %c16_i32 = arith.constant 16 : i32
    %5 = tpu.dynamic_rotate %0 by %c16_i32 dim 1 : vector<8x512xf32>, i32 -> vector<8x512xf32>
    %c15_i32 = arith.constant 15 : i32
    %6 = tpu.dynamic_rotate %0 by %c15_i32 dim 1 : vector<8x512xf32>, i32 -> vector<8x512xf32>
    %c1_i32 = arith.constant 1 : i32
    %7 = tpu.dynamic_rotate %0 by %c1_i32 dim 1 : vector<8x512xf32>, i32 -> vector<8x512xf32>
    %c511_i32 = arith.constant 511 : i32
    %8 = tpu.dynamic_rotate %0 by %c511_i32 dim 1 : vector<8x512xf32>, i32 -> vector<8x512xf32>
    %c497_i32 = arith.constant 497 : i32
    %9 = tpu.dynamic_rotate %0 by %c497_i32 dim 1 : vector<8x512xf32>, i32 -> vector<8x512xf32>
    %c496_i32 = arith.constant 496 : i32
    %10 = tpu.dynamic_rotate %0 by %c496_i32 dim 1 : vector<8x512xf32>, i32 -> vector<8x512xf32>
    %c495_i32 = arith.constant 495 : i32
    %11 = tpu.dynamic_rotate %0 by %c495_i32 dim 1 : vector<8x512xf32>, i32 -> vector<8x512xf32>
    %cst = arith.constant 1.000000e+00 : f32
    %12 = vector.broadcast %cst : f32 to vector<8x512xf32>
    %13 = tpu.concatenate %4, %5, %6, %7, %0, %8, %9, %10, %11, %12 in 0 : vector<8x512xf32>, vector<8x512xf32>, vector<8x512xf32>, vector<8x512xf32>, vector<8x512xf32>, vector<8x512xf32>, vector<8x512xf32>, vector<8x512xf32>, vector<8x512xf32>, vector<8x512xf32> -> vector<80x512xf32>
    %14 = arith.mulf %13, %1 : vector<80x512xf32>
    %15 = vector.extract_strided_slice %2 {offsets = [0, 0], sizes = [16, 80], strides = [1, 1]} : vector<40x80xf32> to vector<16x80xf32>
    %cst_7 = arith.constant dense<0.000000e+00> : vector<16x512xf32>
    %16 = tpu.matmul %15, %14, %cst_7 {dimension_numbers = #tpu.dot_dimension_numbers<[1], [0], [0], [1], [0, 0, 1, 1], [], []>} : vector<16x80xf32>, vector<80x512xf32>, vector<16x512xf32> -> vector<16x512xf32>
    %cst_8 = arith.constant 0.000000e+00 : f32
    %17 = vector.broadcast %cst_8 : f32 to vector<16x512xf32>
    %18 = arith.maximumf %16, %17 : vector<16x512xf32>
    %19 = vector.extract_strided_slice %2 {offsets = [32, 0], sizes = [1, 16], strides = [1, 1]} : vector<40x80xf32> to vector<1x16xf32>
    %cst_9 = arith.constant dense<0.000000e+00> : vector<1x512xf32>
    %20 = tpu.matmul %19, %18, %cst_9 {dimension_numbers = #tpu.dot_dimension_numbers<[1], [0], [0], [1], [0, 0, 1, 1], [], []>} : vector<1x16xf32>, vector<16x512xf32>, vector<1x512xf32> -> vector<1x512xf32>
    %21 = vector.extract_strided_slice %2 {offsets = [32, 16], sizes = [1, 1], strides = [1, 1]} : vector<40x80xf32> to vector<1x1xf32>
    %22 = vector.broadcast %21 : vector<1x1xf32> to vector<1x512xf32>
    %23 = arith.addf %20, %22 : vector<1x512xf32>
    %cst_10 = arith.constant 0.000000e+00 : f32
    %24 = vector.broadcast %cst_10 : f32 to vector<1x512xf32>
    %25 = arith.subf %24, %23 : vector<1x512xf32>
    %26 = math.exp %25 : vector<1x512xf32>
    %cst_11 = arith.constant 1.000000e+00 : f32
    %27 = vector.broadcast %cst_11 : f32 to vector<1x512xf32>
    %28 = arith.addf %27, %26 : vector<1x512xf32>
    %29 = tpu.reciprocal %28 : vector<1x512xf32> -> vector<1x512xf32>
    %30 = tpu.concatenate %23, %29 in 0 : vector<1x512xf32>, vector<1x512xf32> -> vector<2x512xf32>
    %c0_12 = arith.constant 0 : index
    %c0_13 = arith.constant 0 : index
    %31 = vector.load %arg5[%c0_12, %c0_13] : memref<2x512xf32, #tpu.memory_space<vmem>>, vector<2x512xf32>
    tpu.vector_store %arg5[%c0_12, %c0_13], %30 {strides = array<i32>} : memref<2x512xf32, #tpu.memory_space<vmem>>, vector<2x512xf32>,
    %cst_14 = arith.constant 5.000000e-01 : f32
    %32 = vector.broadcast %cst_14 : f32 to vector<1x512xf32>
    %33 = arith.mulf %32, %29 : vector<1x512xf32>
    %cst_15 = arith.constant 1.000000e+00 : f32
    %34 = vector.broadcast %cst_15 : f32 to vector<1x512xf32>
    %35 = arith.addf %34, %33 : vector<1x512xf32>
    %c17_i32_16 = arith.constant 17 : i32
    %36 = tpu.dynamic_rotate %35 by %c17_i32_16 dim 1 : vector<1x512xf32>, i32 -> vector<1x512xf32>
    %37 = vector.extract_strided_slice %14 {offsets = [0, 0], sizes = [8, 512], strides = [1, 1]} : vector<80x512xf32> to vector<8x512xf32>
    %38 = vector.broadcast %36 : vector<1x512xf32> to vector<8x512xf32>
    %39 = arith.mulf %37, %38 : vector<8x512xf32>
    %c16_i32_17 = arith.constant 16 : i32
    %40 = tpu.dynamic_rotate %35 by %c16_i32_17 dim 1 : vector<1x512xf32>, i32 -> vector<1x512xf32>
    %41 = vector.extract_strided_slice %14 {offsets = [8, 0], sizes = [8, 512], strides = [1, 1]} : vector<80x512xf32> to vector<8x512xf32>
    %42 = vector.broadcast %40 : vector<1x512xf32> to vector<8x512xf32>
    %43 = arith.mulf %41, %42 : vector<8x512xf32>
    %c15_i32_18 = arith.constant 15 : i32
    %44 = tpu.dynamic_rotate %35 by %c15_i32_18 dim 1 : vector<1x512xf32>, i32 -> vector<1x512xf32>
    %45 = vector.extract_strided_slice %14 {offsets = [16, 0], sizes = [8, 512], strides = [1, 1]} : vector<80x512xf32> to vector<8x512xf32>
    %46 = vector.broadcast %44 : vector<1x512xf32> to vector<8x512xf32>
    %47 = arith.mulf %45, %46 : vector<8x512xf32>
    %c1_i32_19 = arith.constant 1 : i32
    %48 = tpu.dynamic_rotate %35 by %c1_i32_19 dim 1 : vector<1x512xf32>, i32 -> vector<1x512xf32>
    %49 = vector.extract_strided_slice %14 {offsets = [24, 0], sizes = [8, 512], strides = [1, 1]} : vector<80x512xf32> to vector<8x512xf32>
    %50 = vector.broadcast %48 : vector<1x512xf32> to vector<8x512xf32>
    %51 = arith.mulf %49, %50 : vector<8x512xf32>
    %52 = vector.extract_strided_slice %14 {offsets = [32, 0], sizes = [8, 512], strides = [1, 1]} : vector<80x512xf32> to vector<8x512xf32>
    %53 = vector.broadcast %35 : vector<1x512xf32> to vector<8x512xf32>
    %54 = arith.mulf %52, %53 : vector<8x512xf32>
    %c511_i32_20 = arith.constant 511 : i32
    %55 = tpu.dynamic_rotate %35 by %c511_i32_20 dim 1 : vector<1x512xf32>, i32 -> vector<1x512xf32>
    %56 = vector.extract_strided_slice %14 {offsets = [40, 0], sizes = [8, 512], strides = [1, 1]} : vector<80x512xf32> to vector<8x512xf32>
    %57 = vector.broadcast %55 : vector<1x512xf32> to vector<8x512xf32>
    %58 = arith.mulf %56, %57 : vector<8x512xf32>
    %c497_i32_21 = arith.constant 497 : i32
    %59 = tpu.dynamic_rotate %35 by %c497_i32_21 dim 1 : vector<1x512xf32>, i32 -> vector<1x512xf32>
    %60 = vector.extract_strided_slice %14 {offsets = [48, 0], sizes = [8, 512], strides = [1, 1]} : vector<80x512xf32> to vector<8x512xf32>
    %61 = vector.broadcast %59 : vector<1x512xf32> to vector<8x512xf32>
    %62 = arith.mulf %60, %61 : vector<8x512xf32>
    %c496_i32_22 = arith.constant 496 : i32
    %63 = tpu.dynamic_rotate %35 by %c496_i32_22 dim 1 : vector<1x512xf32>, i32 -> vector<1x512xf32>
    %64 = vector.extract_strided_slice %14 {offsets = [56, 0], sizes = [8, 512], strides = [1, 1]} : vector<80x512xf32> to vector<8x512xf32>
    %65 = vector.broadcast %63 : vector<1x512xf32> to vector<8x512xf32>
    %66 = arith.mulf %64, %65 : vector<8x512xf32>
    %c495_i32_23 = arith.constant 495 : i32
    %67 = tpu.dynamic_rotate %35 by %c495_i32_23 dim 1 : vector<1x512xf32>, i32 -> vector<1x512xf32>
    %68 = vector.extract_strided_slice %14 {offsets = [64, 0], sizes = [8, 512], strides = [1, 1]} : vector<80x512xf32> to vector<8x512xf32>
    %69 = vector.broadcast %67 : vector<1x512xf32> to vector<8x512xf32>
    %70 = arith.mulf %68, %69 : vector<8x512xf32>
    %71 = vector.extract_strided_slice %14 {offsets = [72, 0], sizes = [8, 512], strides = [1, 1]} : vector<80x512xf32> to vector<8x512xf32>
    %72 = tpu.concatenate %39, %43, %47, %51, %54, %58, %62, %66, %70, %71 in 0 : vector<8x512xf32>, vector<8x512xf32>, vector<8x512xf32>, vector<8x512xf32>, vector<8x512xf32>, vector<8x512xf32>, vector<8x512xf32>, vector<8x512xf32>, vector<8x512xf32>, vector<8x512xf32> -> vector<80x512xf32>
    %73 = vector.extract_strided_slice %2 {offsets = [16, 0], sizes = [16, 80], strides = [1, 1]} : vector<40x80xf32> to vector<16x80xf32>
    %cst_24 = arith.constant dense<0.000000e+00> : vector<16x512xf32>
    %74 = tpu.matmul %73, %72, %cst_24 {dimension_numbers = #tpu.dot_dimension_numbers<[1], [0], [0], [1], [0, 0, 1, 1], [], []>} : vector<16x80xf32>, vector<80x512xf32>, vector<16x512xf32> -> vector<16x512xf32>
    %cst_25 = arith.constant 0.000000e+00 : f32
    %75 = vector.broadcast %cst_25 : f32 to vector<16x512xf32>
    %76 = arith.maximumf %74, %75 : vector<16x512xf32>
    %cst_26 = arith.constant dense<0.000000e+00> : vector<16x2xf32>
    %77 = tpu.matmul %76, %3, %cst_26 {dimension_numbers = #tpu.dot_dimension_numbers<[1], [0], [0], [1], [0, 0, 1, 1], [], []>} : vector<16x512xf32>, vector<512x2xf32>, vector<16x2xf32> -> vector<16x2xf32>
    %78 = vector.extract_strided_slice %2 {offsets = [33, 0], sizes = [4, 16], strides = [1, 1]} : vector<40x80xf32> to vector<4x16xf32>
    %cst_27 = arith.constant dense<0.000000e+00> : vector<4x2xf32>
    %79 = tpu.matmul %78, %77, %cst_27 {dimension_numbers = #tpu.dot_dimension_numbers<[1], [0], [0], [1], [0, 0, 1, 1], [], []>} : vector<4x16xf32>, vector<16x2xf32>, vector<4x2xf32> -> vector<4x2xf32>
    %80 = vector.extract_strided_slice %2 {offsets = [33, 16], sizes = [4, 1], strides = [1, 1]} : vector<40x80xf32> to vector<4x1xf32>
    %81 = vector.broadcast %80 : vector<4x1xf32> to vector<4x2xf32>
    %82 = arith.addf %79, %81 : vector<4x2xf32>
    %c0_28 = arith.constant 0 : index
    %c0_29 = arith.constant 0 : index
    %83 = vector.load %arg6[%c0_28, %c0_29] : memref<4x2xf32, #tpu.memory_space<vmem>>, vector<4x2xf32>
    tpu.vector_store %arg6[%c0_28, %c0_29], %82 {strides = array<i32>} : memref<4x2xf32, #tpu.memory_space<vmem>>, vector<4x2xf32>,
    return
  }
  func.func @transform_0(%arg0: i32) -> (i32, i32) {
    %c0_i32 = arith.constant 0 : i32
    %c0_i32_0 = arith.constant 0 : i32
    %c0_i32_1 = arith.constant 0 : i32
    return %c0_i32, %c0_i32_0 : i32, i32
  }
  func.func @transform_1(%arg0: i32) -> (i32, i32) {
    %c0_i32 = arith.constant 0 : i32
    %c0_i32_0 = arith.constant 0 : i32
    %c0_i32_1 = arith.constant 0 : i32
    return %c0_i32, %c0_i32_0 : i32, i32
  }
  func.func @transform_2(%arg0: i32) -> (i32, i32) {
    %c0_i32 = arith.constant 0 : i32
    %c0_i32_0 = arith.constant 0 : i32
    %c0_i32_1 = arith.constant 0 : i32
    return %c0_i32, %c0_i32_0 : i32, i32
  }
  func.func @transform_3(%arg0: i32) -> (i32, i32) {
    %c0_i32 = arith.constant 0 : i32
    %c0_i32_0 = arith.constant 0 : i32
    %c0_i32_1 = arith.constant 0 : i32
    return %c0_i32, %c0_i32_0 : i32, i32
  }
  func.func @transform_4(%arg0: i32) -> (i32, i32) {
    %c0_i32 = arith.constant 0 : i32
    %c0_i32_0 = arith.constant 0 : i32
    %c0_i32_1 = arith.constant 0 : i32
    return %c0_i32, %c0_i32_0 : i32, i32
  }
  func.func @transform_5(%arg0: i32) -> (i32, i32) {
    %c0_i32 = arith.constant 0 : i32
    %c0_i32_0 = arith.constant 0 : i32
    %c0_i32_1 = arith.constant 0 : i32
    return %c0_i32, %c0_i32_0 : i32, i32
  }
}

</mosaic_0001>

<bundles_post_ra>
// kernel: squeeze.7
= control target key start
LH: loop header
LB: loop body
LE: loop exit
PB: predicated region body
PF: predicated region fallthrough
CT: control target
= control target key end

     0   :  { %s135_s0 = inlined_call_operand.vmem [shape: f32[512], index: 0, kind: input, shape index: {}]   ;;  %s136_s1 = inlined_call_operand.hbm [shape: f32[2,1,16,16], index: 1, kind: output, shape index: {}]  }
   0x1   :  { %v5_v0 = vld [vmem:[%s135_s0] sm:$0xf] }
   0x2   :  { %6 = vst [vmem:[#allocation2] sm:$0xf] %v5_v0 }
   0x3   :  { %2 = vsyncpa [#allocation1], 0  ;;  %s94_s0 = smov 112   ;;  %s95_s8 = smov 80   ;;  %vm8_vm0 = vcmask 130048  }
   0x4   :  { %s96_s9 = smov 96   ;;  %s97_s10 = smov 64  }
   0x5   :  { %s98_s11 = smov 48   ;;  %s99_s12 = smov 32  }
   0x6   :  { %s100_s13 = smov 16   ;;  %s101_s14 = smov [#allocation0]  }
   0x7   :  { %s56_s15 = sshll.u32 %s101_s14, 4  ;;  %s57_s15 = int_to_ptr.vmem [resolvable:$true] %s56_s15 }
   0x8   :  { %s70_s16 = scalar_lea.vmem %s57_s15, 512  ;;  %p75_p1 = scmp.lt.s32.totalorder %s57_s15, %s57_s15 }
   0x9   :  { %v10_v1 = vld [vmem:[#allocation2] sm:$0xf]   ;;  %p71_p0 = scmp.ne.s32.totalorder %s57_s15, %s70_s16  ;;  %p76_p2 = scmp.lt.s32.totalorder %s70_s16, %s70_s16 }
   0xa   :  { %v22_v2 = vld [vmem:[#allocation2] sm:$0xf]   ;;  %11 = vrot.lane.b32.xlu0 %v10_v1, %s94_s0 }
   0xb   :  { %23 = vrot.lane.b32.xlu1 %v22_v2, %s95_s8  ;;  %v16_v3 = vld [vmem:[#allocation2] sm:$0xf]   ;;  %p77_p3 = por %p76_p2, %p75_p1 }
   0xc   :  { %v28_v4 = vld [vmem:[#allocation2] sm:$0xf]  }
   0xd   :  { %v7_v5 = vld [vmem:[#allocation2] sm:$0xf]   ;;  %p78_p4 = pnand %p77_p3, %p71_p0 }
   0xe   :  { %9 = vst.msk [vmem:[#allocation0] ss:$8 sm:$0xf] %vm8_vm0, %v7_v5   ;;  %17 = vrot.lane.b32.xlu0 %v16_v3, %s96_s9  ;;  %v34_v6 = vld [vmem:[#allocation2] sm:$0xf]  }
   0xf   :  { %29 = vrot.lane.b32.xlu1 %v28_v4, %s97_s10  ;;  %v40_v7 = vld [vmem:[#allocation2] sm:$0xf]  }
  0x10   :  { %v46_v8 = vld [vmem:[#allocation2] sm:$0xf]  }
  0x12   :  { %35 = vrot.lane.b32.xlu0 %v34_v6, %s98_s11 }
  0x13   :  { %41 = vrot.lane.b32.xlu1 %v40_v7, %s99_s12 }
  0x16   :  { %47 = vrot.lane.b32.xlu0 %v46_v8, %s100_s13 }
  0x7c   :  { %v12_v9 = vpop.permute.xlu0 %11  }
  0x7d   :  { %v24_v10 = vpop.permute.xlu1 %23   ;;  %15 = vst.msk [vmem:[#allocation0 + $0x1] ss:$8 sm:$0xf] %vm8_vm0, %v12_v9  }
  0x7e   :  { %27 = vst.msk [vmem:[#allocation0 + $0x3] ss:$8 sm:$0xf] %vm8_vm0, %v24_v10  }
  0x80   :  { %v18_v11 = vpop.permute.xlu0 %17  }
  0x81   :  { %v30_v12 = vpop.permute.xlu1 %29   ;;  %21 = vst.msk [vmem:[#allocation0 + $0x2] ss:$8 sm:$0xf] %vm8_vm0, %v18_v11  }
  0x82   :  { %33 = vst.msk [vmem:[#allocation0 + $0x4] ss:$8 sm:$0xf] %vm8_vm0, %v30_v12  }
  0x84   :  { %v36_v13 = vpop.permute.xlu0 %35  }
  0x85   :  { %v42_v14 = vpop.permute.xlu1 %41   ;;  %39 = vst.msk [vmem:[#allocation0 + $0x5] ss:$8 sm:$0xf] %vm8_vm0, %v36_v13  }
  0x86   :  { %45 = vst.msk [vmem:[#allocation0 + $0x6] ss:$8 sm:$0xf] %vm8_vm0, %v42_v14  }
  0x88   :  { %v48_v15 = vpop.permute.xlu0 %47  }
  0x89   :  { %51 = vst.msk [vmem:[#allocation0 + $0x7] ss:$8 sm:$0xf] %vm8_vm0, %v48_v15  }
  0x8a   :  { %81 = shalt.err (!%p78_p4)
}
  0x8b   :  { %s82_s19 = scalar_lea.hbm %s136_s1, 512 }
  0x8c   :  { %p83_p5 = scmp.ne.s32.totalorder %s136_s1, %s82_s19  ;;  %p86_p6 = scmp.lt.u32.totalorder %s82_s19, %s136_s1 }
  0x8e   :  { %p88_p7 = pnand %p86_p6, %p83_p5 }
  0x90   :  { %91 = shalt.err (!%p88_p7)
}
  0x91   :  { %59 = dma.vmem_to_hbm [thread:$0]  %s57_s15, 512, %s136_s1, [#allocation1]  }
  0x92   :  { %92 = dma.done.wait [#allocation1], 512  }
  0x93   :  { %93 = vsyncadd [#allocation1], 4294966784 }
  0x94   :  { %61 = vsyncpa [#allocation1], 1 }

// kernel: combined_forward.1
= control target key start
LH: loop header
LB: loop body
LE: loop exit
PB: predicated region body
PF: predicated region fallthrough
CT: control target
= control target key end

     0   :  { %s1622_s22 = smov 17   ;;  %s1623_s27 = smov 16   ;;  %v2557_v4 = vmov 0.0   ;;  %v140_v5 = vlaneseq  ;;  %vm274_vm8 = vcmask 654336   ;;  %vm448_vm9 = vcmask 130048   ;;  %s2551_s0 = inlined_call_operand.vmem [shape: f32[8,512], index: 0, kind: input, shape index: {}]   ;;  %s2552_s1 = inlined_call_operand.vmem [shape: f32[80,512], index: 1, kind: input, shape index: {}]   ;;  %s2553_s2 = inlined_call_operand.vmem [shape: f32[40,80], index: 2, kind: input, shape index: {}]   ;;  %s2554_s4 = inlined_call_operand.vmem [shape: f32[2,512], index: 4, kind: output, shape index: {0}]   ;;  %s2555_s3 = inlined_call_operand.vmem [shape: f32[512,2], index: 3, kind: input, shape index: {}]   ;;  %s2556_s5 = inlined_call_operand.vmem [shape: f32[4,2], index: 5, kind: output, shape index: {1}]  }
   0x1   :  { %v1668_v0 = vld [vmem:[%s2551_s0 + $0x10] sm:$0xff]  ;;  %v1673_v1 = vld [vmem:[%s2551_s0] sm:$0xff]  ;;  %v1682_v2 = vld [vmem:[%s2551_s0 + $0x18] sm:$0xff]  ;;  %s1625_s28 = smov 1   ;;  %s1626_s29 = smov 127   ;;  %345 = vmatprep.mubr.f32.mxu0 %v2557_v4  ;;  %422 = vmatprep.mubr.f32.mxu1 %v2557_v4  ;;  %vm625_vm10 = vcmask 1040384  }
   0x2   :  { %136 = vrot.lane.b32.xlu1 %v1668_v0, %s1622_s22  ;;  %132 = vrot.lane.b32.xlu0 %v1673_v1, %s1622_s22  ;;  %v1687_v3 = vld [vmem:[%s2551_s0 + $0x8] sm:$0xff]  ;;  %s1624_s0 = smov 15   ;;  %s1627_s30 = smov 113   ;;  %v1752_v8 = vand.u32 127, %v140_v5  ;;  %v23_v16 = vld [vmem:[%s2552_s1] sm:$0xff]  ;;  %vm1634_vm11 = vmmov 0  }
   0x3   :  { %s1628_s6 = smov 112   ;;  %s1630_s7 = smov 111   ;;  %v24_v12 = vld [vmem:[%s2552_s1 + $0x8] sm:$0xff]  ;;  %v25_v19 = vld [vmem:[%s2552_s1 + $0x10] sm:$0xff]  ;;  %v27_v21 = vld [vmem:[%s2552_s1 + $0x20] sm:$0xff]  ;;  %vm1330_vm12 = vcmask 11264  }
   0x4   :  { %vm142_vm0 = vcmp.lt.s32.totalorder %v1752_v8, 17  ;;  %vm155_vm1 = vcmp.lt.s32.totalorder %v1752_v8, 16  ;;  %v28_v13 = vld [vmem:[%s2552_s1 + $0x28] sm:$0xff]  ;;  %v29_v25 = vld [vmem:[%s2552_s1 + $0x30] sm:$0xff]  ;;  %v26_v26 = vld [vmem:[%s2552_s1 + $0x18] sm:$0xff]  ;;  %vm168_vm2 = vcmp.lt.s32.totalorder %v1752_v8, 15 }
   0x5   :  { %v30_v27 = vld [vmem:[%s2552_s1 + $0x38] sm:$0xff]  ;;  %vm181_vm3 = vcmp.lt.s32.totalorder %v1752_v8, 1  ;;  %v32_v47 = vld [vmem:[%s2552_s1 + $0x48] sm:$0xff]  ;;  %v31_v52 = vld [vmem:[%s2552_s1 + $0x40] sm:$0xff]  ;;  %vm194_vm4 = vcmp.lt.s32.totalorder %v1752_v8, 127  ;;  %vm220_vm5 = vcmp.lt.s32.totalorder %v1752_v8, 112 }
   0x6   :  { %138 = vrot.lane.b32.xlu1 %v1682_v2, %s1622_s22  ;;  %134 = vrot.lane.b32.xlu0 %v1687_v3, %s1622_s22  ;;  %v36_v49 = vld [vmem:[%s2552_s1 + $0x68] sm:$0xff]  ;;  %v33_v56 = vld [vmem:[%s2552_s1 + $0x50] sm:$0xff]  ;;  %vm207_vm6 = vcmp.lt.s32.totalorder %v1752_v8, 113  ;;  %vm233_vm7 = vcmp.lt.s32.totalorder %v1752_v8, 111 }
   0x7   :  { %v34_v57 = vld [vmem:[%s2552_s1 + $0x58] sm:$0xff]  ;;  %v35_v61 = vld [vmem:[%s2552_s1 + $0x60] sm:$0xff]  ;;  %v37_v62 = vld [vmem:[%s2552_s1 + $0x70] sm:$0xff] }
   0x8   :  { %v38_v63 = vld [vmem:[%s2552_s1 + $0x78] sm:$0xff]  ;;  %v116_v8 = vld [vmem:[%s2555_s3 + $0x180] sm:$0xff] }
   0xa   :  { %149 = vrot.lane.b32.xlu1 %v1687_v3, %s1623_s27  ;;  %147 = vrot.lane.b32.xlu0 %v1673_v1, %s1623_s27 }
   0xe   :  { %153 = vrot.lane.b32.xlu1 %v1682_v2, %s1623_s27  ;;  %151 = vrot.lane.b32.xlu0 %v1668_v0, %s1623_s27 }
  0x12   :  { %162 = vrot.lane.b32.xlu1 %v1687_v3, %s1624_s0  ;;  %160 = vrot.lane.b32.xlu0 %v1673_v1, %s1624_s0 }
  0x16   :  { %166 = vrot.lane.b32.xlu1 %v1682_v2, %s1624_s0  ;;  %164 = vrot.lane.b32.xlu0 %v1668_v0, %s1624_s0 }
  0x1a   :  { %175 = vrot.lane.b32.xlu1 %v1687_v3, %s1625_s28  ;;  %173 = vrot.lane.b32.xlu0 %v1673_v1, %s1625_s28 }
  0x1e   :  { %179 = vrot.lane.b32.xlu1 %v1682_v2, %s1625_s28  ;;  %177 = vrot.lane.b32.xlu0 %v1668_v0, %s1625_s28 }
  0x22   :  { %188 = vrot.lane.b32.xlu1 %v1687_v3, %s1626_s29  ;;  %186 = vrot.lane.b32.xlu0 %v1673_v1, %s1626_s29 }
  0x26   :  { %192 = vrot.lane.b32.xlu1 %v1682_v2, %s1626_s29  ;;  %190 = vrot.lane.b32.xlu0 %v1668_v0, %s1626_s29 }
  0x2a   :  { %201 = vrot.lane.b32.xlu1 %v1687_v3, %s1627_s30  ;;  %199 = vrot.lane.b32.xlu0 %v1673_v1, %s1627_s30 }
  0x2e   :  { %205 = vrot.lane.b32.xlu1 %v1682_v2, %s1627_s30  ;;  %203 = vrot.lane.b32.xlu0 %v1668_v0, %s1627_s30 }
  0x32   :  { %214 = vrot.lane.b32.xlu1 %v1687_v3, %s1628_s6  ;;  %212 = vrot.lane.b32.xlu0 %v1673_v1, %s1628_s6 }
  0x36   :  { %218 = vrot.lane.b32.xlu1 %v1682_v2, %s1628_s6  ;;  %216 = vrot.lane.b32.xlu0 %v1668_v0, %s1628_s6 }
  0x3a   :  { %227 = vrot.lane.b32.xlu1 %v1687_v3, %s1630_s7  ;;  %225 = vrot.lane.b32.xlu0 %v1673_v1, %s1630_s7 }
  0x3e   :  { %231 = vrot.lane.b32.xlu1 %v1682_v2, %s1630_s7  ;;  %229 = vrot.lane.b32.xlu0 %v1668_v0, %s1630_s7 }
  0x74   :  { %v137_v6 = vpop.permute.xlu1 %136  ;;  %v133_v7 = vpop.permute.xlu0 %132 }
  0x78   :  { %v139_v9 = vpop.permute.xlu1 %138  ;;  %v135_v10 = vpop.permute.xlu0 %134 }
  0x79   :  { %v145_v11 = vsel %vm142_vm0, %v133_v7, %v135_v10  ;;  %v146_v17 = vsel %vm142_vm0, %v139_v9, %v133_v7  ;;  %v144_v20 = vsel %vm142_vm0, %v135_v10, %v137_v6  ;;  %v143_v24 = vsel %vm142_vm0, %v137_v6, %v139_v9 }
  0x7a   :  { %v1779_v22 = vmul.f32 %v145_v11, %v24_v12  ;;  %v1794_v28 = vmul.f32 %v146_v17, %v23_v16  ;;  %v1798_v32 = vmul.f32 %v144_v20, %v25_v19  ;;  %v1810_v38 = vmul.f32 %v143_v24, %v26_v26  ;;  %v39_v26 = vld [vmem:[%s2552_s1 + $0x80] sm:$0xff] }
  0x7c   :  { %v150_v14 = vpop.permute.xlu1 %149  ;;  %v148_v15 = vpop.permute.xlu0 %147 }
  0x7d   :  { %v158_v18 = vsel %vm155_vm1, %v148_v15, %v150_v14 }
  0x7e   :  { %v1781_v23 = vmul.f32 %v158_v18, %v28_v13 }
  0x80   :  { %v154_v29 = vpop.permute.xlu1 %153  ;;  %v152_v30 = vpop.permute.xlu0 %151  ;;  %v1437_v31 = vpack.c.bf16 %v1781_v23, %v1779_v22 }
  0x81   :  { %v159_v33 = vsel %vm155_vm1, %v154_v29, %v148_v15  ;;  %v156_v34 = vsel %vm155_vm1, %v152_v30, %v154_v29  ;;  %v157_v35 = vsel %vm155_vm1, %v150_v14, %v152_v30  ;;  %v42_v29 = vld [vmem:[%s2552_s1 + $0x98] sm:$0xff]  ;;  %v41_v30 = vld [vmem:[%s2552_s1 + $0x90] sm:$0xff] }
  0x82   :  { %v1806_v36 = vmul.f32 %v159_v33, %v27_v21  ;;  %v1808_v37 = vmul.f32 %v157_v35, %v29_v25  ;;  %1438 = vmatprep.subr.bf16.mxu0 %v1437_v31  ;;  %v1812_v39 = vmul.f32 %v156_v34, %v30_v27  ;;  %v40_v27 = vld [vmem:[%s2552_s1 + $0x88] sm:$0xff]  ;;  %v43_v31 = vld [vmem:[%s2552_s1 + $0xa0] sm:$0xff]  ;;  %v46_v34 = vld [vmem:[%s2552_s1 + $0xb8] sm:$0xff] }
  0x83   :  { %v44_v35 = vld [vmem:[%s2552_s1 + $0xa8] sm:$0xff] }
  0x84   :  { %v163_v40 = vpop.permute.xlu1 %162  ;;  %v161_v41 = vpop.permute.xlu0 %160  ;;  %v1439_v42 = vpack.c.bf16 %v1806_v36, %v1794_v28  ;;  %v1457_v43 = vpack.c.bf16 %v1812_v39, %v1810_v38  ;;  %v1459_v44 = vpack.c.bf16 %v1808_v37, %v1798_v32 }
  0x85   :  { %v171_v48 = vsel %vm168_vm2, %v161_v41, %v163_v40 }
  0x86   :  { %1440 = vmatpush1.bf16.msra.mxu0 %v1439_v42  ;;  %1458 = vmatprep.subr.bf16.mxu1 %v1457_v43  ;;  %v1837_v55 = vmul.f32 %v171_v48, %v32_v47  ;;  %v1914_v43 = vmul.f32 %v40_v27, %v1687_v3 }
  0x87   :  { %1460 = vmatpush1.bf16.msra.mxu1 %v1459_v44  ;;  %v1917_v44 = vmul.f32 %v42_v29, %v1682_v2 }
  0x88   :  { %v167_v45 = vpop.permute.xlu1 %166  ;;  %v165_v46 = vpop.permute.xlu0 %164 }
  0x89   :  { %v172_v53 = vsel %vm168_vm2, %v167_v45, %v161_v41  ;;  %v170_v58 = vsel %vm168_vm2, %v163_v40, %v165_v46  ;;  %v169_v60 = vsel %vm168_vm2, %v165_v46, %v167_v45  ;;  %v45_v40 = vld [vmem:[%s2552_s1 + $0xb0] sm:$0xff]  ;;  %v1920_v45 = vmul.f32 %v39_v26, %v1673_v1 }
  0x8a   :  { %v1860_v6 = vmul.f32 %v172_v53, %v31_v52  ;;  %v1864_v11 = vmul.f32 %v170_v58, %v33_v56  ;;  %v1872_v15 = vmul.f32 %v169_v60, %v34_v57  ;;  %v1923_v46 = vmul.f32 %v41_v30, %v1668_v0 }
  0x8c   :  { %v176_v50 = vpop.permute.xlu1 %175  ;;  %v174_v51 = vpop.permute.xlu0 %173 }
  0x8d   :  { %v184_v54 = vsel %vm181_vm3, %v174_v51, %v176_v50 }
  0x8e   :  { %v1847_v59 = vmul.f32 %v184_v54, %v36_v49 }
  0x90   :  { %v180_v7 = vpop.permute.xlu1 %179  ;;  %v178_v9 = vpop.permute.xlu0 %177  ;;  %v1441_v10 = vpack.c.bf16 %v1847_v59, %v1837_v55 }
  0x91   :  { %v185_v12 = vsel %vm181_vm3, %v180_v7, %v174_v51  ;;  %v182_v13 = vsel %vm181_vm3, %v178_v9, %v180_v7  ;;  %v183_v14 = vsel %vm181_vm3, %v176_v50, %v178_v9  ;;  %v48_v7 = vld [vmem:[%s2552_s1 + $0xc8] sm:$0xff] }
  0x92   :  { %v1874_v16 = vmul.f32 %v185_v12, %v35_v61  ;;  %v1876_v17 = vmul.f32 %v183_v14, %v37_v62  ;;  %v1878_v18 = vmul.f32 %v182_v13, %v38_v63  ;;  %1442 = vmatprep.subr.bf16.mxu0 %v1441_v10  ;;  %v50_v62 = vld [vmem:[%s2552_s1 + $0xd8] sm:$0xff]  ;;  %v49_v10 = vld [vmem:[%s2552_s1 + $0xd0] sm:$0xff]  ;;  %v51_v12 = vld [vmem:[%s2552_s1 + $0xe0] sm:$0xff] }
  0x94   :  { %v189_v19 = vpop.permute.xlu1 %188  ;;  %v187_v20 = vpop.permute.xlu0 %186  ;;  %v1443_v21 = vpack.c.bf16 %v1874_v16, %v1860_v6  ;;  %v1461_v24 = vpack.c.bf16 %v1878_v18, %v1872_v15  ;;  %v1463_v25 = vpack.c.bf16 %v1876_v17, %v1864_v11 }
  0x95   :  { %v197_v33 = vsel %vm194_vm4, %v187_v20, %v189_v19 }
  0x96   :  { %1444 = vmatpush1.bf16.msra.mxu0 %v1443_v21  ;;  %1462 = vmatprep.subr.bf16.mxu1 %v1461_v24  ;;  %v1925_v47 = vmul.f32 %v197_v33, %v43_v31  ;;  %v53_v21 = vld [vmem:[%s2552_s1 + $0xf0] sm:$0xff]  ;;  %v47_v24 = vld [vmem:[%s2552_s1 + $0xc0] sm:$0xff] }
  0x97   :  { %1464 = vmatpush1.bf16.msra.mxu1 %v1463_v25 }
  0x98   :  { %v193_v41 = vpop.permute.xlu1 %192  ;;  %v191_v42 = vpop.permute.xlu0 %190  ;;  %v1447_v56 = vpack.c.bf16 %v1925_v47, %v1920_v45 }
  0x99   :  { %v198_v48 = vsel %vm194_vm4, %v193_v41, %v187_v20  ;;  %v195_v49 = vsel %vm194_vm4, %v191_v42, %v193_v41  ;;  %v196_v3 = vsel %vm194_vm4, %v189_v19, %v191_v42  ;;  %v54_v19 = vld [vmem:[%s2552_s1 + $0xf8] sm:$0xff]  ;;  %v52_v20 = vld [vmem:[%s2552_s1 + $0xe8] sm:$0xff] }
  0x9a   :  { %v1933_v50 = vmul.f32 %v198_v48, %v46_v34  ;;  %v1935_v2 = vmul.f32 %v196_v3, %v44_v35  ;;  %v1937_v1 = vmul.f32 %v195_v49, %v45_v40 }
  0x9c   :  { %v202_v51 = vpop.permute.xlu1 %201  ;;  %v200_v0 = vpop.permute.xlu0 %199  ;;  %v1445_v52 = vpack.c.bf16 %v1935_v2, %v1914_v43  ;;  %v1465_v53 = vpack.c.bf16 %v1933_v50, %v1917_v44  ;;  %v1467_v54 = vpack.c.bf16 %v1937_v1, %v1923_v46 }
  0x9d   :  { %v210_v25 = vsel %vm207_vm6, %v200_v0, %v202_v51 }
  0x9e   :  { %1446 = vmatprep.subr.bf16.mxu0 %v1445_v52  ;;  %1466 = vmatprep.subr.bf16.mxu1 %v1465_v53  ;;  %v2003_v49 = vmul.f32 %v210_v25, %v47_v24  ;;  %v2060_v25 = vld [vmem:[%s2552_s1 + $0x120] sm:$0xff] }
  0x9f   :  { %1448 = vmatpush1.bf16.msra.mxu0 %v1447_v56  ;;  %1468 = vmatpush1.bf16.msra.mxu1 %v1467_v54  ;;  %v55_v56 = vld [vmem:[%s2552_s1 + $0x100] sm:$0xff] }
  0xa0   :  { %v206_v57 = vpop.permute.xlu1 %205  ;;  %v204_v58 = vpop.permute.xlu0 %203 }
  0xa1   :  { %v211_v63 = vsel %vm207_vm6, %v206_v57, %v200_v0  ;;  %v209_v9 = vsel %vm207_vm6, %v202_v51, %v204_v58  ;;  %v208_v14 = vsel %vm207_vm6, %v204_v58, %v206_v57  ;;  %v58_v58 = vld [vmem:[%s2552_s1 + $0x118] sm:$0xff] }
  0xa2   :  { %v1983_v26 = vmul.f32 %v211_v63, %v50_v62  ;;  %v1985_v27 = vmul.f32 %v209_v9, %v48_v7  ;;  %v1995_v40 = vmul.f32 %v208_v14, %v49_v10  ;;  %v2044_v14 = vld [vmem:[%s2552_s1 + $0x138] sm:$0xff] }
  0xa3   :  { %2564 = vst [vmem:[#allocation2_spill] sm:$0xff] %v2044_v14 }
  0xa4   :  { %v215_v60 = vpop.permute.xlu1 %214  ;;  %v213_v61 = vpop.permute.xlu0 %212 }
  0xa5   :  { %v223_v13 = vsel %vm220_vm5, %v213_v61, %v215_v60 }
  0xa6   :  { %v1987_v31 = vmul.f32 %v223_v13, %v51_v12  ;;  %v2039_v13 = vld [vmem:[%s2552_s1 + $0x128] sm:$0xff] }
  0xa8   :  { %v219_v29 = vpop.permute.xlu1 %218  ;;  %v217_v30 = vpop.permute.xlu0 %216  ;;  %v1451_v54 = vpack.c.bf16 %v1987_v31, %v2003_v49 }
  0xa9   :  { %v224_v33 = vsel %vm220_vm5, %v219_v29, %v213_v61  ;;  %v221_v34 = vsel %vm220_vm5, %v217_v30, %v219_v29  ;;  %v222_v35 = vsel %vm220_vm5, %v215_v60, %v217_v30  ;;  %v56_v60 = vld [vmem:[%s2552_s1 + $0x108] sm:$0xff]  ;;  %v57_v61 = vld [vmem:[%s2552_s1 + $0x110] sm:$0xff] }
  0xaa   :  { %v1997_v41 = vmul.f32 %v224_v33, %v54_v19  ;;  %v1999_v42 = vmul.f32 %v222_v35, %v52_v20  ;;  %v2001_v48 = vmul.f32 %v221_v34, %v53_v21  ;;  %v2049_v19 = vld [vmem:[%s2552_s1 + $0x130] sm:$0xff]  ;;  %v63_v35 = vld [vmem:[%s2553_s2] sm:$0xff] }
  0xab   :  { %2565 = vst [vmem:[#allocation3_spill] sm:$0xff] %v2049_v19 }
  0xac   :  { %v228_v3 = vpop.permute.xlu1 %227  ;;  %v226_v51 = vpop.permute.xlu0 %225  ;;  %v1449_v0 = vpack.c.bf16 %v1999_v42, %v1985_v27  ;;  %v1469_v52 = vpack.c.bf16 %v1997_v41, %v1983_v26  ;;  %v1471_v53 = vpack.c.bf16 %v2001_v48, %v1995_v40 }
  0xad   :  { %v236_v57 = vsel %vm233_vm7, %v226_v51, %v228_v3 }
  0xae   :  { %1450 = vmatprep.subr.bf16.mxu0 %v1449_v0  ;;  %1470 = vmatprep.subr.bf16.mxu1 %v1469_v52  ;;  %v2028_v7 = vmul.f32 %v236_v57, %v55_v56  ;;  %v1631_v0 = vmov 16  }
  0xaf   :  { %1452 = vmatpush1.bf16.msra.mxu0 %v1451_v54  ;;  %1472 = vmatpush1.bf16.msra.mxu1 %v1471_v53 }
  0xb0   :  { %v232_v62 = vpop.permute.xlu1 %231  ;;  %v230_v63 = vpop.permute.xlu0 %229  ;;  %v1455_v34 = vpack.c.bf16 %v2060_v25, %v2028_v7  ;;  %1605 = vset.pattern.permute.xlu0 %v1631_v0 }
  0xb1   :  { %v237_v9 = vsel %vm233_vm7, %v232_v62, %v226_v51  ;;  %v234_v10 = vsel %vm233_vm7, %v230_v63, %v232_v62  ;;  %v235_v12 = vsel %vm233_vm7, %v228_v3, %v230_v63  ;;  %v64_v3 = vld [vmem:[%s2553_s2 + $0x8] sm:$0xff]  ;;  %v2087_v51 = vld [vmem:[%s2553_s2 + $0x20] sm:$0xff] }
  0xb2   :  { %v2051_v20 = vmul.f32 %v237_v9, %v58_v58  ;;  %v2053_v21 = vmul.f32 %v235_v12, %v56_v60  ;;  %v2055_v24 = vmul.f32 %v234_v10, %v57_v61  ;;  %2567 = vst [vmem:[#allocation5_spill] sm:$0xff] %v2087_v51  ;;  %445 = vperm.xlu0 %1605, %v2087_v51  }
  0xb4   :  { %2566 = vst [vmem:[#allocation4_spill] sm:$0xff] %v2051_v20  ;;  %v1453_v29 = vpack.c.bf16 %v2039_v13, %v2053_v21  ;;  %v1473_v30 = vpack.c.bf16 %v2044_v14, %v2051_v20  ;;  %v1475_v33 = vpack.c.bf16 %v2049_v19, %v2055_v24 }
  0xb6   :  { %1454 = vmatprep.subr.bf16.mxu0 %v1453_v29  ;;  %1474 = vmatprep.subr.bf16.mxu1 %v1473_v30 }
  0xb7   :  { %1456 = vmatpush1.bf16.msra.mxu0 %v1455_v34  ;;  %1476 = vmatpush1.bf16.msra.mxu1 %v1475_v33 }
  0xba   :  { %1340 = vmatmul.mubr.msk.f32.vlgmr.msra.gmra.mrb[0].mxu0 %vm274_vm8, %v63_v35  ;;  %1342 = vmatmul.mubr.msk.f32.vlgmr.msra.gmra.mrb[0].mxu1 %vm274_vm8, %v63_v35 }
  0xbb   :  { %351 = vmatprep.mubr.f32.mxu0 %v2557_v4  ;;  %428 = vmatprep.mubr.f32.mxu1 %v2557_v4 }
  0xbe   :  { %1341 = vmatmul.mubr.msk.f32.gmra.mrb[2].mxu0 %vm274_vm8, %v64_v3  ;;  %1343 = vmatmul.mubr.msk.f32.gmra.mrb[2].mxu1 %vm274_vm8, %v64_v3 }
  0xbf   :  { %515 = vmatprep.mubr.f32.mxu0 %v2557_v4  ;;  %586 = vmatprep.mubr.f32.mxu1 %v2557_v4 }
 0x18d   :  { %v347_v52 = vpop.f32.mrb[0].mxu0  ;;  %v424_v53 = vpop.f32.mrb[0].mxu1 }
 0x18e   :  { %v349_v54 = vpop.f32.mrb[1].mxu0  ;;  %v426_v56 = vpop.f32.mrb[1].mxu1  ;;  %v437_v57 = vmax.f32 %v424_v53, 0.0  ;;  %v435_v62 = vmax.f32 %v347_v52, 0.0 }
 0x18f   :  { %v438_v58 = vmax.f32 %v426_v56, 0.0  ;;  %v436_v29 = vmax.f32 %v349_v54, 0.0  ;;  %v2096_v52 = vpop.permute.xlu0 %445 }
 0x190   :  { %2568 = vst [vmem:[#allocation6_spill] sm:$0xff] %v2096_v52 }
 0x191   :  { %v353_v60 = vpop.f32.mrb[2].mxu0  ;;  %v430_v61 = vpop.f32.mrb[2].mxu1 }
 0x192   :  { %v439_v63 = vmax.f32 %v353_v60, 0.0  ;;  %v441_v9 = vmax.f32 %v430_v61, 0.0  ;;  %v355_v10 = vpop.f32.mrb[3].mxu0  ;;  %v432_v12 = vpop.f32.mrb[3].mxu1 }
 0x193   :  { %v440_v30 = vmax.f32 %v355_v10, 0.0  ;;  %v442_v33 = vmax.f32 %v432_v12, 0.0 }
 0x194   :  { %v1479_v34 = vpack.c.bf16 %v439_v63, %v435_v62  ;;  %v1483_v35 = vpack.c.bf16 %v441_v9, %v437_v57 }
 0x195   :  { %v1477_v3 = vpack.c.bf16 %v440_v30, %v436_v29  ;;  %v1481_v0 = vpack.c.bf16 %v442_v33, %v438_v58 }
 0x197   :  { %1478 = vmatprep.subr.bf16.mxu0 %v1477_v3  ;;  %1482 = vmatprep.subr.bf16.mxu1 %v1481_v0 }
 0x198   :  { %1480 = vmatpush1.bf16.msra.mxu0 %v1479_v34  ;;  %1484 = vmatpush1.bf16.msra.mxu1 %v1483_v35 }
 0x19b   :  { %1344 = vmatmul.mubr.msk.f32.vlgmr.msra.gmra.mrb[4].mxu0 %vm448_vm9, %v2087_v51  ;;  %1345 = vmatmul.mubr.msk.f32.vlgmr.msra.gmra.mrb[4].mxu1 %vm448_vm9, %v2087_v51 }
 0x19c   :  { %1007 = vmatprep.mubr.f32.mxu0 %v2557_v4  ;;  %1084 = vmatprep.mubr.f32.mxu1 %v2557_v4 }
 0x26e   :  { %v588_v53 = vpop.f32.mrb[4].mxu1  ;;  %v517_v54 = vpop.f32.mrb[4].mxu0 }
 0x26f   :  { %v589_v56 = vadd.f32 %v588_v53, %v2096_v52  ;;  %v518_v57 = vadd.f32 %v517_v54, %v2096_v52  ;;  %v519_v58 = vpop.f32.mrb[5].mxu0  ;;  %v590_v60 = vpop.f32.mrb[5].mxu1 }
 0x270   :  { %v520_v61 = vadd.f32 %v519_v58, %v2096_v52  ;;  %v591_v62 = vadd.f32 %v590_v60, %v2096_v52 }
 0x271   :  { %v595_v63 = vsub.f32 0.0, %v589_v56  ;;  %v593_v9 = vsub.f32 0.0, %v518_v57 }
 0x272   :  { %v594_v10 = vsub.f32 0.0, %v520_v61  ;;  %v596_v12 = vsub.f32 0.0, %v591_v62 }
 0x273   :  { %v601_v29 = vmul.f32 1.442695, %v595_v63  ;;  %v597_v30 = vmul.f32 1.442695, %v593_v9  ;;  %v1632_v63 = vmov 1983009808  }
 0x274   :  { %v599_v33 = vmul.f32 1.442695, %v594_v10  ;;  %v603_v34 = vmul.f32 1.442695, %v596_v12  ;;  %v637_v9 = vunpack.c.l.s4 %v1632_v63  ;;  %v640_v10 = vshrl.u32 %v140_v5, 7 }
 0x275   :  { %1606 = vpow2.f32 %v601_v29 }
 0x276   :  { %1608 = vpow2.f32 %v597_v30  ;;  %v638_v12 = vunpack.c.0.s8 %v637_v9 }
 0x277   :  { %1610 = vpow2.f32 %v599_v33 }
 0x278   :  { %1612 = vpow2.f32 %v603_v34  ;;  %v2103_v34 = vsub.s32 0, %v640_v10 }
 0x27f   :  { %v1607_v35 = vpop.eup %1606 }
 0x280   :  { %v1609_v3 = vpop.eup %1608  ;;  %v607_v0 = vadd.f32 1.0, %v1607_v35 }
 0x281   :  { %v1611_v53 = vpop.eup %1610  ;;  %v605_v54 = vadd.f32 1.0, %v1609_v3 }
 0x282   :  { %v1613_v58 = vpop.eup %1612  ;;  %1614 = vrcp.f32 %v607_v0  ;;  %v606_v60 = vadd.f32 1.0, %v1611_v53  ;;  %v641_v53 = vsub.s32 %v638_v12, %v640_v10 }
 0x283   :  { %1616 = vrcp.f32 %v605_v54  ;;  %v608_v4 = vadd.f32 1.0, %v1613_v58 }
 0x284   :  { %1618 = vrcp.f32 %v606_v60 }
 0x285   :  { %1620 = vrcp.f32 %v608_v4 }
 0x28c   :  { %v1615_v29 = vpop.eup %1614 }
 0x28d   :  { %v1617_v30 = vpop.eup %1616  ;;  %v655_v33 = vmul.f32 0.5, %v1615_v29  ;;  %v619_v35 = vrot.slane %v1615_v29, 7 }
 0x28e   :  { %v1619_v3 = vpop.eup %1618  ;;  %v617_v52 = vrot.slane %v1617_v30, 7  ;;  %v653_v0 = vmul.f32 0.5, %v1617_v30 }
 0x28f   :  { %v1621_v54 = vpop.eup %1620  ;;  %v2105_v58 = vadd.f32 1.0, %v655_v33  ;;  %v618_v4 = vrot.slane %v1619_v3, 7  ;;  %v654_v60 = vmul.f32 0.5, %v1619_v3  ;;  %v628_v63 = vsel %vm625_vm10, %v589_v56, %v619_v35 }
 0x290   :  { %v626_v5 = vsel %vm625_vm10, %v518_v57, %v617_v52  ;;  %v2109_v9 = vadd.f32 1.0, %v653_v0  ;;  %v620_v51 = vrot.slane %v1621_v54, 7  ;;  %v656_v14 = vmul.f32 0.5, %v1621_v54 }
 0x291   :  { %v627_v19 = vsel %vm625_vm10, %v520_v61, %v618_v4  ;;  %v2112_v29 = vadd.f32 1.0, %v654_v60  ;;  %665 = vrot.lane.b32.xlu0 %v2105_v58, %s1622_s22 }
 0x292   :  { %v634_v12 = vcombine.low %v626_v5, %v627_v19  ;;  %v629_v30 = vsel %vm625_vm10, %v591_v62, %v620_v51  ;;  %v2119_v56 = vadd.f32 1.0, %v656_v14  ;;  %661 = vrot.lane.b32.xlu1 %v2109_v9, %s1622_s22 }
 0x293   :  { %v635_v57 = vcombine.low %v628_v63, %v629_v30 }
 0x294   :  { %v642_v33 = vrot.slane %v634_v12, %v641_v53 }
 0x295   :  { %v649_v3 = vrot.slane %v635_v57, %v641_v53  ;;  %693 = vrot.lane.b32.xlu0 %v2109_v9, %s1623_s27 }
 0x296   :  { %663 = vrot.lane.b32.xlu1 %v2112_v29, %s1622_s22 }
 0x297   :  { %v650_v14 = vcombine.low %v642_v33, %v649_v3 }
 0x299   :  { %652 = vst [vmem:[%s2554_s4] sm:$0xff] %v650_v14  ;;  %697 = vrot.lane.b32.xlu0 %v2105_v58, %s1623_s27 }
 0x29a   :  { %667 = vrot.lane.b32.xlu1 %v2119_v56, %s1622_s22 }
 0x29d   :  { %725 = vrot.lane.b32.xlu0 %v2109_v9, %s1624_s0 }
 0x29e   :  { %695 = vrot.lane.b32.xlu1 %v2112_v29, %s1623_s27 }
 0x2a1   :  { %729 = vrot.lane.b32.xlu0 %v2105_v58, %s1624_s0 }
 0x2a2   :  { %699 = vrot.lane.b32.xlu1 %v2119_v56, %s1623_s27 }
 0x2a5   :  { %757 = vrot.lane.b32.xlu0 %v2109_v9, %s1625_s28 }
 0x2a6   :  { %727 = vrot.lane.b32.xlu1 %v2112_v29, %s1624_s0 }
 0x2a9   :  { %761 = vrot.lane.b32.xlu0 %v2105_v58, %s1625_s28 }
 0x2aa   :  { %731 = vrot.lane.b32.xlu1 %v2119_v56, %s1624_s0 }
 0x2ad   :  { %809 = vrot.lane.b32.xlu0 %v2109_v9, %s1626_s29 }
 0x2ae   :  { %759 = vrot.lane.b32.xlu1 %v2112_v29, %s1625_s28 }
 0x2b1   :  { %813 = vrot.lane.b32.xlu0 %v2105_v58, %s1626_s29 }
 0x2b2   :  { %763 = vrot.lane.b32.xlu1 %v2119_v56, %s1625_s28 }
 0x2b5   :  { %841 = vrot.lane.b32.xlu0 %v2109_v9, %s1627_s30 }
 0x2b6   :  { %811 = vrot.lane.b32.xlu1 %v2112_v29, %s1626_s29 }
 0x2b9   :  { %845 = vrot.lane.b32.xlu0 %v2105_v58, %s1627_s30 }
 0x2ba   :  { %815 = vrot.lane.b32.xlu1 %v2119_v56, %s1626_s29 }
 0x2bd   :  { %873 = vrot.lane.b32.xlu0 %v2109_v9, %s1628_s6 }
 0x2be   :  { %843 = vrot.lane.b32.xlu1 %v2112_v29, %s1627_s30 }
 0x2c1   :  { %877 = vrot.lane.b32.xlu0 %v2105_v58, %s1628_s6 }
 0x2c2   :  { %847 = vrot.lane.b32.xlu1 %v2119_v56, %s1627_s30 }
 0x2c5   :  { %905 = vrot.lane.b32.xlu0 %v2109_v9, %s1630_s7 }
 0x2c6   :  { %875 = vrot.lane.b32.xlu1 %v2112_v29, %s1628_s6 }
 0x2c9   :  { %909 = vrot.lane.b32.xlu0 %v2105_v58, %s1630_s7 }
 0x2ca   :  { %879 = vrot.lane.b32.xlu1 %v2119_v56, %s1628_s6 }
 0x2ce   :  { %907 = vrot.lane.b32.xlu1 %v2112_v29, %s1630_s7 }
 0x2d2   :  { %911 = vrot.lane.b32.xlu1 %v2119_v56, %s1630_s7 }
 0x303   :  { %v666_v19 = vpop.permute.xlu0 %665 }
 0x304   :  { %v662_v51 = vpop.permute.xlu1 %661 }
 0x307   :  { %v694_v62 = vpop.permute.xlu0 %693 }
 0x308   :  { %v664_v0 = vpop.permute.xlu1 %663 }
 0x309   :  { %v671_v4 = vsel %vm142_vm0, %v662_v51, %v664_v0  ;;  %v670_v3 = vsel %vm142_vm0, %v664_v0, %v666_v19 }
 0x30a   :  { %v680_v63 = vrot.slane %v671_v4, %v2103_v34  ;;  %v684_v20 = vrot.slane %v670_v3, %v2103_v34 }
 0x30b   :  { %v698_v53 = vpop.permute.xlu0 %697 }
 0x30c   :  { %v668_v54 = vpop.permute.xlu1 %667  ;;  %v690_v10 = vmul.f32 %v680_v63, %v1779_v22 }
 0x30d   :  { %v669_v12 = vsel %vm142_vm0, %v666_v19, %v668_v54  ;;  %v672_v30 = vsel %vm142_vm0, %v668_v54, %v662_v51 }
 0x30e   :  { %v676_v61 = vrot.slane %v672_v30, %v2103_v34  ;;  %v688_v51 = vrot.slane %v669_v12, %v2103_v34 }
 0x30f   :  { %v726_v60 = vpop.permute.xlu0 %725 }
 0x310   :  { %v696_v5 = vpop.permute.xlu1 %695  ;;  %v689_v12 = vmul.f32 %v676_v61, %v1794_v28 }
 0x311   :  { %v702_v57 = vsel %vm155_vm1, %v696_v5, %v698_v53  ;;  %v703_v33 = vsel %vm155_vm1, %v694_v62, %v696_v5 }
 0x312   :  { %v712_v14 = vrot.slane %v703_v33, %v2103_v34  ;;  %v716_v4 = vrot.slane %v702_v57, %v2103_v34 }
 0x313   :  { %v730_v35 = vpop.permute.xlu0 %729 }
 0x314   :  { %v722_v54 = vmul.f32 %v712_v14, %v1781_v23  ;;  %v700_v52 = vpop.permute.xlu1 %699  ;;  %v723_v63 = vmul.f32 %v716_v4, %v1808_v37  ;;  %v692_v23 = vmul.f32 %v688_v51, %v1810_v38 }
 0x315   :  { %v701_v5 = vsel %vm155_vm1, %v698_v53, %v700_v52  ;;  %v704_v19 = vsel %vm155_vm1, %v700_v52, %v694_v62  ;;  %v691_v52 = vmul.f32 %v684_v20, %v1798_v32 }
 0x316   :  { %v708_v0 = vrot.slane %v704_v19, %v2103_v34  ;;  %v720_v57 = vrot.slane %v701_v5, %v2103_v34  ;;  %v1485_v22 = vpack.c.bf16 %v722_v54, %v690_v10 }
 0x317   :  { %v758_v30 = vpop.permute.xlu0 %757  ;;  %v1507_v19 = vpack.c.bf16 %v723_v63, %v691_v52 }
 0x318   :  { %v721_v33 = vmul.f32 %v708_v0, %v1806_v36  ;;  %v724_v3 = vmul.f32 %v720_v57, %v1812_v39  ;;  %1486 = vmatprep.subr.bf16.mxu0 %v1485_v22  ;;  %v728_v53 = vpop.permute.xlu1 %727 }
 0x319   :  { %v735_v28 = vsel %vm168_vm2, %v726_v60, %v728_v53  ;;  %v734_v4 = vsel %vm168_vm2, %v728_v53, %v730_v35 }
 0x31a   :  { %v1487_v62 = vpack.c.bf16 %v721_v33, %v689_v12  ;;  %v1505_v14 = vpack.c.bf16 %v724_v3, %v692_v23  ;;  %v744_v36 = vrot.slane %v735_v28, %v2103_v34  ;;  %v748_v23 = vrot.slane %v734_v4, %v2103_v34 }
 0x31b   :  { %v762_v5 = vpop.permute.xlu0 %761  ;;  %v2570_v4 = vrot.slane %v2112_v29, %v2103_v34 }
 0x31c   :  { %1488 = vmatpush1.bf16.msra.mxu0 %v1487_v62  ;;  %1506 = vmatprep.subr.bf16.mxu1 %v1505_v14  ;;  %v732_v37 = vpop.permute.xlu1 %731  ;;  %v754_v57 = vmul.f32 %v744_v36, %v1837_v55 }
 0x31d   :  { %1508 = vmatpush1.bf16.msra.mxu1 %v1507_v19  ;;  %v733_v39 = vsel %vm168_vm2, %v730_v35, %v732_v37  ;;  %v736_v32 = vsel %vm168_vm2, %v732_v37, %v726_v60 }
 0x31e   :  { %v740_v22 = vrot.slane %v736_v32, %v2103_v34  ;;  %v752_v60 = vrot.slane %v733_v39, %v2103_v34 }
 0x31f   :  { %v810_v38 = vpop.permute.xlu0 %809 }
 0x320   :  { %v760_v10 = vpop.permute.xlu1 %759  ;;  %v753_v14 = vmul.f32 %v740_v22, %v1860_v6 }
 0x321   :  { %v766_v20 = vsel %vm181_vm3, %v760_v10, %v762_v5  ;;  %v767_v61 = vsel %vm181_vm3, %v758_v30, %v760_v10 }
 0x322   :  { %v776_v51 = vrot.slane %v767_v61, %v2103_v34  ;;  %v780_v54 = vrot.slane %v766_v20, %v2103_v34 }
 0x323   :  { %v814_v0 = vpop.permute.xlu0 %813 }
 0x324   :  { %v786_v63 = vmul.f32 %v776_v51, %v1847_v59  ;;  %v764_v12 = vpop.permute.xlu1 %763  ;;  %v787_v52 = vmul.f32 %v780_v54, %v1876_v17  ;;  %v756_v59 = vmul.f32 %v752_v60, %v1872_v15  ;;  %v806_v51 = vmul.f32 %v2570_v4, %v1914_v43 }
 0x325   :  { %v765_v33 = vsel %vm181_vm3, %v762_v5, %v764_v12  ;;  %v768_v35 = vsel %vm181_vm3, %v764_v12, %v758_v30  ;;  %v755_v30 = vmul.f32 %v748_v23, %v1864_v11  ;;  %v2571_v60 = vrot.slane %v2105_v58, %v2103_v34 }
 0x326   :  { %v772_v3 = vrot.slane %v768_v35, %v2103_v34  ;;  %v784_v53 = vrot.slane %v765_v33, %v2103_v34  ;;  %v1489_v55 = vpack.c.bf16 %v786_v63, %v754_v57 }
 0x327   :  { %v842_v62 = vpop.permute.xlu0 %841  ;;  %v1511_v39 = vpack.c.bf16 %v787_v52, %v755_v30  ;;  %v807_v29 = vmul.f32 %v2571_v60, %v1923_v46 }
 0x328   :  { %v785_v19 = vmul.f32 %v772_v3, %v1874_v16  ;;  %v788_v37 = vmul.f32 %v784_v53, %v1878_v18  ;;  %1490 = vmatprep.subr.bf16.mxu0 %v1489_v55  ;;  %v812_v5 = vpop.permute.xlu1 %811  ;;  %v2569_v16 = vrot.slane %v2109_v9, %v2103_v34 }
 0x329   :  { %v818_v28 = vsel %vm194_vm4, %v812_v5, %v814_v0  ;;  %v819_v36 = vsel %vm194_vm4, %v810_v38, %v812_v5 }
 0x32a   :  { %v1491_v17 = vpack.c.bf16 %v785_v19, %v753_v14  ;;  %v824_v10 = vrot.slane %v819_v36, %v2103_v34  ;;  %v828_v6 = vrot.slane %v818_v28, %v2103_v34  ;;  %v1509_v15 = vpack.c.bf16 %v788_v37, %v756_v59 }
 0x32b   :  { %v805_v18 = vmul.f32 %v2569_v16, %v1920_v45  ;;  %v846_v32 = vpop.permute.xlu0 %845 }
 0x32c   :  { %v837_v11 = vmul.f32 %v824_v10, %v1925_v47  ;;  %v838_v20 = vmul.f32 %v828_v6, %v1935_v2  ;;  %1492 = vmatpush1.bf16.msra.mxu0 %v1491_v17  ;;  %1510 = vmatprep.subr.bf16.mxu1 %v1509_v15  ;;  %v816_v61 = vpop.permute.xlu1 %815 }
 0x32d   :  { %v817_v54 = vsel %vm194_vm4, %v814_v0, %v816_v61  ;;  %v820_v9 = vsel %vm194_vm4, %v816_v61, %v810_v38  ;;  %1512 = vmatpush1.bf16.msra.mxu1 %v1511_v39  ;;  %v2572_v38 = vrot.slane %v2119_v56, %v2103_v34 }
 0x32e   :  { %v1495_v45 = vpack.c.bf16 %v837_v11, %v805_v18  ;;  %v832_v47 = vrot.slane %v817_v54, %v2103_v34  ;;  %v836_v2 = vrot.slane %v820_v9, %v2103_v34  ;;  %v1493_v57 = vpack.c.bf16 %v838_v20, %v806_v51 }
 0x32f   :  { %v874_v22 = vpop.permute.xlu0 %873  ;;  %v808_v12 = vmul.f32 %v2572_v38, %v1917_v44  ;;  %v87_v38 = vld [vmem:[%s2555_s3 + $0x98] sm:$0xff] }
 0x330   :  { %v839_v43 = vmul.f32 %v832_v47, %v1937_v1  ;;  %v840_v0 = vmul.f32 %v836_v2, %v1933_v50  ;;  %1494 = vmatprep.subr.bf16.mxu0 %v1493_v57  ;;  %v844_v63 = vpop.permute.xlu1 %843 }
 0x331   :  { %1496 = vmatpush1.bf16.msra.mxu0 %v1495_v45  ;;  %v850_v35 = vsel %vm207_vm6, %v844_v63, %v846_v32  ;;  %v851_v46 = vsel %vm207_vm6, %v842_v62, %v844_v63  ;;  %v86_v63 = vld [vmem:[%s2555_s3 + $0x90] sm:$0xff] }
 0x332   :  { %v1515_v23 = vpack.c.bf16 %v839_v43, %v807_v29  ;;  %v1513_v33 = vpack.c.bf16 %v840_v0, %v808_v12  ;;  %v856_v50 = vrot.slane %v851_v46, %v2103_v34  ;;  %v860_v3 = vrot.slane %v850_v35, %v2103_v34  ;;  %v69_v43 = vld [vmem:[%s2555_s3 + $0x8] sm:$0xff]  ;;  %v2573_v0 = vld [vmem:[#allocation4_spill] sm:$0xff]  ;;  %v2575_v35 = vld [vmem:[#allocation2_spill] sm:$0xff] }
 0x333   :  { %v878_v58 = vpop.permute.xlu0 %877  ;;  %v65_v12 = vld [vmem:[%s2553_s2 + $0x10] sm:$0xff] }
 0x334   :  { %1514 = vmatprep.subr.bf16.mxu1 %v1513_v33  ;;  %v848_v1 = vpop.permute.xlu1 %847  ;;  %v869_v37 = vmul.f32 %v856_v50, %v2003_v49  ;;  %v870_v5 = vmul.f32 %v860_v3, %v1985_v27  ;;  %v101_v50 = vld [vmem:[%s2555_s3 + $0x108] sm:$0xff]  ;;  %v70_v3 = vld [vmem:[%s2555_s3 + $0x10] sm:$0xff] }
 0x335   :  { %1516 = vmatpush1.bf16.msra.mxu1 %v1515_v23  ;;  %v849_v44 = vsel %vm207_vm6, %v846_v32, %v848_v1  ;;  %v852_v56 = vsel %vm207_vm6, %v848_v1, %v842_v62  ;;  %v2574_v23 = vld [vmem:[#allocation3_spill] sm:$0xff]  ;;  %v100_v1 = vld [vmem:[%s2555_s3 + $0x100] sm:$0xff] }
 0x336   :  { %v864_v30 = vrot.slane %v849_v44, %v2103_v34  ;;  %v868_v28 = vrot.slane %v852_v56, %v2103_v34  ;;  %v71_v44 = vld [vmem:[%s2555_s3 + $0x18] sm:$0xff]  ;;  %v118_v56 = vld [vmem:[%s2555_s3 + $0x190] sm:$0xff] }
 0x337   :  { %v906_v14 = vpop.permute.xlu0 %905 }
 0x338   :  { %v876_v53 = vpop.permute.xlu1 %875  ;;  %v871_v16 = vmul.f32 %v864_v30, %v1995_v40  ;;  %v872_v18 = vmul.f32 %v868_v28, %v1983_v26  ;;  %v102_v28 = vld [vmem:[%s2555_s3 + $0x110] sm:$0xff] }
 0x339   :  { %v882_v55 = vsel %vm220_vm5, %v876_v53, %v878_v58  ;;  %v883_v52 = vsel %vm220_vm5, %v874_v22, %v876_v53  ;;  %v1529_v53 = vpack.c.bf16 %v87_v38, %v86_v63  ;;  %v126_v63 = vld [vmem:[%s2555_s3 + $0x1d0] sm:$0xff]  ;;  %v127_v38 = vld [vmem:[%s2555_s3 + $0x1d8] sm:$0xff] }
 0x33a   :  { %v888_v59 = vrot.slane %v883_v52, %v2103_v34  ;;  %v892_v19 = vrot.slane %v882_v55, %v2103_v34  ;;  %v119_v55 = vld [vmem:[%s2555_s3 + $0x198] sm:$0xff]  ;;  %v88_v52 = vld [vmem:[%s2555_s3 + $0xa0] sm:$0xff] }
 0x33b   :  { %v1561_v30 = vpack.c.bf16 %v119_v55, %v118_v56  ;;  %v128_v56 = vld [vmem:[%s2555_s3 + $0x1e0] sm:$0xff]  ;;  %v129_v55 = vld [vmem:[%s2555_s3 + $0x1e8] sm:$0xff] }
 0x33c   :  { %v901_v62 = vmul.f32 %v888_v59, %v1987_v31  ;;  %v902_v36 = vmul.f32 %v892_v19, %v1999_v42  ;;  %v880_v17 = vpop.permute.xlu1 %879  ;;  %v910_v31 = vpop.permute.xlu0 %909  ;;  %v2576_v59 = vmov 0.0   ;;  %v66_v19 = vld [vmem:[%s2553_s2 + $0x18] sm:$0xff] }
 0x33d   :  { %v881_v10 = vsel %vm220_vm5, %v878_v58, %v880_v17  ;;  %v884_v6 = vsel %vm220_vm5, %v880_v17, %v874_v22 }
 0x33e   :  { %v1499_v15 = vpack.c.bf16 %v901_v62, %v869_v37  ;;  %v896_v49 = vrot.slane %v881_v10, %v2103_v34  ;;  %v900_v27 = vrot.slane %v884_v6, %v2103_v34  ;;  %v1497_v39 = vpack.c.bf16 %v902_v36, %v870_v5  ;;  %v103_v62 = vld [vmem:[%s2555_s3 + $0x118] sm:$0xff]  ;;  %v72_v36 = vld [vmem:[%s2555_s3 + $0x20] sm:$0xff]  ;;  %v73_v10 = vld [vmem:[%s2555_s3 + $0x28] sm:$0xff] }
 0x33f   :  { %v1559_v37 = vpack.c.bf16 %v101_v50, %v100_v1  ;;  %v1531_v5 = vpack.c.bf16 %v71_v44, %v70_v3  ;;  %v120_v6 = vld [vmem:[%s2555_s3 + $0x1a0] sm:$0xff]  ;;  %v81_v3 = vld [vmem:[%s2555_s3 + $0x68] sm:$0xff] }
 0x340   :  { %v903_v42 = vmul.f32 %v896_v49, %v2001_v48  ;;  %v904_v32 = vmul.f32 %v900_v27, %v1997_v41  ;;  %v908_v11 = vpop.permute.xlu1 %907  ;;  %1498 = vmatprep.subr.bf16.mxu0 %v1497_v39  ;;  %v84_v48 = vld [vmem:[%s2555_s3 + $0x80] sm:$0xff]  ;;  %v85_v41 = vld [vmem:[%s2555_s3 + $0x88] sm:$0xff]  ;;  %v90_v49 = vld [vmem:[%s2555_s3 + $0xb0] sm:$0xff]  ;;  %v1563_v39 = vpack.c.bf16 %v103_v62, %v102_v28 }
 0x341   :  { %v914_v20 = vsel %vm233_vm7, %v908_v11, %v910_v31  ;;  %v915_v61 = vsel %vm233_vm7, %v906_v14, %v908_v11  ;;  %1500 = vmatpush1.bf16.msra.mxu0 %v1499_v15  ;;  %v1525_v57 = vpack.c.bf16 %v85_v41, %v84_v48  ;;  %v121_v15 = vld [vmem:[%s2555_s3 + $0x1a8] sm:$0xff]  ;;  %v91_v27 = vld [vmem:[%s2555_s3 + $0xb8] sm:$0xff]  ;;  %v80_v50 = vld [vmem:[%s2555_s3 + $0x60] sm:$0xff] }
 0x342   :  { %v1519_v4 = vpack.c.bf16 %v903_v42, %v871_v16  ;;  %v920_v51 = vrot.slane %v915_v61, %v2103_v34  ;;  %v924_v40 = vrot.slane %v914_v20, %v2103_v34  ;;  %v1517_v26 = vpack.c.bf16 %v904_v32, %v872_v18  ;;  %v105_v42 = vld [vmem:[%s2555_s3 + $0x128] sm:$0xff]  ;;  %v74_v32 = vld [vmem:[%s2555_s3 + $0x30] sm:$0xff]  ;;  %v75_v20 = vld [vmem:[%s2555_s3 + $0x38] sm:$0xff] }
 0x343   :  { %v1535_v16 = vpack.c.bf16 %v73_v10, %v72_v36  ;;  %v1565_v18 = vpack.c.bf16 %v121_v15, %v120_v6  ;;  %v1537_v11 = vpack.c.bf16 %v91_v27, %v90_v49  ;;  %v122_v61 = vld [vmem:[%s2555_s3 + $0x1b0] sm:$0xff]  ;;  %v1539_v48 = vpack.c.bf16 %v75_v20, %v74_v32  ;;  %v83_v62 = vld [vmem:[%s2555_s3 + $0x78] sm:$0xff] }
 0x344   :  { %v933_v54 = vmul.f32 %v920_v51, %v2028_v7  ;;  %v934_v9 = vmul.f32 %v924_v40, %v2053_v21  ;;  %1518 = vmatprep.subr.bf16.mxu1 %v1517_v26  ;;  %v912_v45 = vpop.permute.xlu1 %911  ;;  %v68_v21 = vld [vmem:[%s2555_s3] sm:$0xff]  ;;  %v93_v40 = vld [vmem:[%s2555_s3 + $0xc8] sm:$0xff]  ;;  %v1551_v44 = vpack.c.bf16 %v81_v3, %v80_v50  ;;  %v82_v28 = vld [vmem:[%s2555_s3 + $0x70] sm:$0xff] }
 0x345   :  { %v913_v47 = vsel %vm233_vm7, %v910_v31, %v912_v45  ;;  %v916_v2 = vsel %vm233_vm7, %v912_v45, %v906_v14  ;;  %1520 = vmatpush1.bf16.msra.mxu1 %v1519_v4  ;;  %v1527_v46 = vpack.c.bf16 %v69_v43, %v68_v21  ;;  %v89_v14 = vld [vmem:[%s2555_s3 + $0xa8] sm:$0xff]  ;;  %v104_v31 = vld [vmem:[%s2555_s3 + $0x120] sm:$0xff]  ;;  %v123_v4 = vld [vmem:[%s2555_s3 + $0x1b8] sm:$0xff] }
 0x346   :  { %v1503_v22 = vpack.c.bf16 %v2060_v25, %v933_v54  ;;  %v928_v60 = vrot.slane %v913_v47, %v2103_v34  ;;  %v932_v29 = vrot.slane %v916_v2, %v2103_v34  ;;  %v1501_v7 = vpack.c.bf16 %v2039_v13, %v934_v9  ;;  %v117_v25 = vld [vmem:[%s2555_s3 + $0x188] sm:$0xff]  ;;  %v92_v51 = vld [vmem:[%s2555_s3 + $0xc0] sm:$0xff]  ;;  %v106_v54 = vld [vmem:[%s2555_s3 + $0x130] sm:$0xff] }
 0x347   :  { %v1557_v58 = vpack.c.bf16 %v117_v25, %v116_v8  ;;  %v1533_v17 = vpack.c.bf16 %v89_v14, %v88_v52  ;;  %v1567_v26 = vpack.c.bf16 %v105_v42, %v104_v31  ;;  %v1569_v41 = vpack.c.bf16 %v123_v4, %v122_v61  ;;  %v107_v9 = vld [vmem:[%s2555_s3 + $0x138] sm:$0xff]  ;;  %v76_v45 = vld [vmem:[%s2555_s3 + $0x40] sm:$0xff]  ;;  %v77_v2 = vld [vmem:[%s2555_s3 + $0x48] sm:$0xff] }
 0x348   :  { %v935_v34 = vmul.f32 %v928_v60, %v2055_v24  ;;  %v936_v13 = vmul.f32 %v932_v29, %v2573_v0  ;;  %1502 = vmatprep.subr.bf16.mxu0 %v1501_v7  ;;  %v1541_v47 = vpack.c.bf16 %v93_v40, %v92_v51  ;;  %v94_v60 = vld [vmem:[%s2555_s3 + $0xd0] sm:$0xff]  ;;  %v95_v29 = vld [vmem:[%s2555_s3 + $0xd8] sm:$0xff]  ;;  %v1571_v7 = vpack.c.bf16 %v107_v9, %v106_v54  ;;  %v108_v8 = vld [vmem:[%s2555_s3 + $0x140] sm:$0xff] }
 0x349   :  { %1504 = vmatpush1.bf16.msra.mxu0 %v1503_v22  ;;  %v125_v22 = vld [vmem:[%s2555_s3 + $0x1c8] sm:$0xff]  ;;  %v1543_v21 = vpack.c.bf16 %v77_v2, %v76_v45  ;;  %v1545_v0 = vpack.c.bf16 %v95_v29, %v94_v60  ;;  %v1581_v52 = vpack.c.bf16 %v129_v55, %v128_v56  ;;  %v98_v14 = vld [vmem:[%s2555_s3 + $0xf0] sm:$0xff]  ;;  %v131_v6 = vld [vmem:[%s2555_s3 + $0x1f8] sm:$0xff]  ;;  %v1633_v45 = vmov 0.0|0.0  }
 0x34a   :  { %v1523_v33 = vpack.c.bf16 %v2574_v23, %v935_v34  ;;  %v1521_v24 = vpack.c.bf16 %v2575_v35, %v936_v13  ;;  %1526 = vmatprep.subr.bf16.mxu0 %v1525_v57  ;;  %v124_v57 = vld [vmem:[%s2555_s3 + $0x1c0] sm:$0xff]  ;;  %v109_v25 = vld [vmem:[%s2555_s3 + $0x148] sm:$0xff]  ;;  %v78_v34 = vld [vmem:[%s2555_s3 + $0x50] sm:$0xff] }
 0x34b   :  { %v1573_v43 = vpack.c.bf16 %v125_v22, %v124_v57  ;;  %v79_v13 = vld [vmem:[%s2555_s3 + $0x58] sm:$0xff]  ;;  %v97_v23 = vld [vmem:[%s2555_s3 + $0xe8] sm:$0xff]  ;;  %v130_v10 = vld [vmem:[%s2555_s3 + $0x1f0] sm:$0xff] }
 0x34c   :  { %1522 = vmatprep.subr.bf16.mxu1 %v1521_v24  ;;  %1346 = vmatmul.mubr.msk.f32.vlgmr.msra.gmra.mrb[6].mxu0 %vm274_vm8, %v65_v12  ;;  %v1547_v35 = vpack.c.bf16 %v79_v13, %v78_v34  ;;  %v1577_v24 = vpack.c.bf16 %v127_v38, %v126_v63  ;;  %v1585_v15 = vpack.c.bf16 %v131_v6, %v130_v10  ;;  %v114_v49 = vld [vmem:[%s2555_s3 + $0x170] sm:$0xff]  ;;  %v115_v27 = vld [vmem:[%s2555_s3 + $0x178] sm:$0xff] }
 0x34d   :  { %1524 = vmatpush1.bf16.msra.mxu1 %v1523_v33  ;;  %1013 = vmatprep.mubr.f32.mxu0 %v2576_v59  ;;  %v1575_v33 = vpack.c.bf16 %v109_v25, %v108_v8  ;;  %v2577_v38 = vld [vmem:[#allocation5_spill] sm:$0xff] }
 0x34e   :  { %1528 = vmatpush3.bf16.msra.mxu0 %v1527_v46  ;;  %1558 = vmatprep.subr.bf16.mxu1 %v1557_v58  ;;  %v110_v46 = vld [vmem:[%s2555_s3 + $0x150] sm:$0xff]  ;;  %v111_v58 = vld [vmem:[%s2555_s3 + $0x158] sm:$0xff] }
 0x34f   :  { %1530 = vmatprep.subr.bf16.mxu0 %v1529_v53  ;;  %v1579_v53 = vpack.c.bf16 %v111_v58, %v110_v46 }
 0x350   :  { %1348 = vmatmul.mubr.msk.f32.vlgmr.msra.gmra.mrb[6].mxu1 %vm274_vm8, %v65_v12  ;;  %1347 = vmatmul.mubr.msk.f32.gmra.mrb[8].mxu0 %vm274_vm8, %v66_v19  ;;  %v96_v12 = vld [vmem:[%s2555_s3 + $0xe0] sm:$0xff] }
 0x351   :  { %1090 = vmatprep.mubr.f32.mxu1 %v2576_v59  ;;  %1560 = vmatpush3.bf16.msra.mxu1 %v1559_v37  ;;  %v1549_v1 = vpack.c.bf16 %v97_v23, %v96_v12  ;;  %v112_v37 = vld [vmem:[%s2555_s3 + $0x160] sm:$0xff]  ;;  %v1255_v12 = vrot.slane %v2577_v38, 1 }
 0x352   :  { %1532 = vmatpush3.bf16.msra.mxu0 %v1531_v5  ;;  %1562 = vmatprep.subr.bf16.mxu1 %v1561_v30  ;;  %v113_v30 = vld [vmem:[%s2555_s3 + $0x168] sm:$0xff] }
 0x353   :  { %1534 = vmatprep.subr.bf16.mxu0 %v1533_v17  ;;  %v1583_v36 = vpack.c.bf16 %v113_v30, %v112_v37  ;;  %v1555_v17 = vpack.c.bf16 %v83_v62, %v82_v28 }
 0x354   :  { %1349 = vmatmul.mubr.msk.f32.gmra.mrb[8].mxu1 %vm274_vm8, %v66_v19  ;;  %v99_v19 = vld [vmem:[%s2555_s3 + $0xf8] sm:$0xff] }
 0x355   :  { %1564 = vmatpush3.bf16.msra.mxu1 %v1563_v39  ;;  %v1553_v5 = vpack.c.bf16 %v99_v19, %v98_v14  ;;  %v1587_v39 = vpack.c.bf16 %v115_v27, %v114_v49 }
 0x356   :  { %1536 = vmatpush3.bf16.msra.mxu0 %v1535_v16  ;;  %1566 = vmatprep.subr.bf16.mxu1 %v1565_v18 }
 0x357   :  { %1538 = vmatprep.subr.bf16.mxu0 %v1537_v11 }
 0x359   :  { %1568 = vmatpush3.bf16.msra.mxu1 %v1567_v26 }
 0x35a   :  { %1540 = vmatpush3.bf16.msra.mxu0 %v1539_v48  ;;  %1570 = vmatprep.subr.bf16.mxu1 %v1569_v41 }
 0x35b   :  { %1542 = vmatprep.subr.bf16.mxu0 %v1541_v47 }
 0x35d   :  { %1572 = vmatpush3.bf16.msra.mxu1 %v1571_v7 }
 0x35e   :  { %1544 = vmatpush3.bf16.msra.mxu0 %v1543_v21  ;;  %1574 = vmatprep.subr.bf16.mxu1 %v1573_v43 }
 0x35f   :  { %1546 = vmatprep.subr.bf16.mxu0 %v1545_v0 }
 0x361   :  { %1576 = vmatpush3.bf16.msra.mxu1 %v1575_v33 }
 0x362   :  { %1548 = vmatpush3.bf16.msra.mxu0 %v1547_v35  ;;  %1578 = vmatprep.subr.bf16.mxu1 %v1577_v24 }
 0x363   :  { %1550 = vmatprep.subr.bf16.mxu0 %v1549_v1 }
 0x365   :  { %1580 = vmatpush3.bf16.msra.mxu1 %v1579_v53 }
 0x366   :  { %1552 = vmatpush3.bf16.msra.mxu0 %v1551_v44  ;;  %1582 = vmatprep.subr.bf16.mxu1 %v1581_v52 }
 0x367   :  { %1554 = vmatprep.subr.bf16.mxu0 %v1553_v5 }
 0x369   :  { %1584 = vmatpush3.bf16.msra.mxu1 %v1583_v36 }
 0x36a   :  { %1556 = vmatpush3.bf16.msra.mxu0 %v1555_v17  ;;  %1586 = vmatprep.subr.bf16.mxu1 %v1585_v15 }
 0x36b   :  { %1589 = vmatprep.subr.bf16.mxu0 %v1633_v45 }
 0x36d   :  { %1588 = vmatpush3.bf16.msra.mxu1 %v1587_v39 }
 0x41f   :  { %v1009_v16 = vpop.f32.mrb[6].mxu0 }
 0x420   :  { %v1097_v18 = vmax.f32 %v1009_v16, 0.0  ;;  %v1011_v31 = vpop.f32.mrb[7].mxu0 }
 0x421   :  { %v1098_v42 = vmax.f32 %v1011_v31, 0.0 }
 0x423   :  { %v1086_v32 = vpop.f32.mrb[6].mxu1  ;;  %v1015_v11 = vpop.f32.mrb[8].mxu0  ;;  %1169 = vmatprep.mubr.f32.mxu0 %v1098_v42 }
 0x424   :  { %v1101_v20 = vmax.f32 %v1015_v11, 0.0  ;;  %v1088_v61 = vpop.f32.mrb[7].mxu1  ;;  %v1017_v4 = vpop.f32.mrb[9].mxu0  ;;  %1170 = vmatmul.mubr.f32.vlgmr.msra.gmra.mrb[10].mxu0 %v1097_v18  ;;  %v1099_v26 = vmax.f32 %v1086_v32, 0.0 }
 0x425   :  { %v1100_v51 = vmax.f32 %v1088_v61, 0.0  ;;  %v1102_v40 = vmax.f32 %v1017_v4, 0.0 }
 0x427   :  { %v1092_v48 = vpop.f32.mrb[8].mxu1  ;;  %1244 = vmatprep.mubr.f32.mxu1 %v1100_v51  ;;  %1174 = vmatprep.mubr.f32.mxu0 %v1102_v40 }
 0x428   :  { %v1094_v41 = vpop.f32.mrb[9].mxu1  ;;  %1245 = vmatmul.mubr.f32.vlgmr.msra.gmra.mrb[10].mxu1 %v1099_v26  ;;  %1175 = vmatmul.mubr.f32.gmra.mrb[12].mxu0 %v1101_v20  ;;  %v1103_v9 = vmax.f32 %v1092_v48, 0.0 }
 0x429   :  { %v1104_v54 = vmax.f32 %v1094_v41, 0.0  ;;  %1434 = vmatprep.mubr.msk.f32.mxu0 %vm1634_vm11, %v2576_v59  ;;  %v2578_v59 = vld [vmem:[#allocation6_spill] sm:$0xff] }
 0x42a   :  { %v1256_v23 = vrot.slane %v2578_v59, 1 }
 0x42b   :  { %1249 = vmatprep.mubr.f32.mxu1 %v1104_v54 }
 0x42c   :  { %1250 = vmatmul.mubr.f32.gmra.mrb[12].mxu1 %v1103_v9 }
 0x4f7   :  { %v1383_v47 = vpop.f32.mrb[10].mxu0 }
 0x4f8   :  { %v1384_v2 = vpop.f32.mrb[11].mxu0 }
 0x4f9   :  { %v1385_v57 = vadd.f32 %v1384_v2, %v1383_v47 }
 0x4fb   :  { %v1421_v22 = vpop.f32.mrb[10].mxu1  ;;  %v1386_v60 = vpop.f32.mrb[12].mxu0 }
 0x4fc   :  { %v1422_v29 = vpop.f32.mrb[11].mxu1  ;;  %v1387_v7 = vpop.f32.mrb[13].mxu0 }
 0x4fd   :  { %v1423_v21 = vadd.f32 %v1422_v29, %v1421_v22  ;;  %v1388_v43 = vadd.f32 %v1387_v7, %v1386_v60 }
 0x4ff   :  { %v1247_v8 = vadd.f32 %v1423_v21, %v1385_v57  ;;  %v1424_v25 = vpop.f32.mrb[12].mxu1 }
 0x500   :  { %v1425_v34 = vpop.f32.mrb[13].mxu1 }
 0x501   :  { %v1426_v0 = vadd.f32 %v1425_v34, %v1424_v25 }
 0x503   :  { %v1252_v13 = vadd.f32 %v1426_v0, %v1388_v43 }
 0x505   :  { %v1590_v63 = vpack.c.bf16 %v1252_v13, %v1247_v8 }
 0x507   :  { %1591 = vmatpush3.bf16.msra.mxu0 %v1590_v63 }
 0x50a   :  { %1435 = vmatmul.mubr.msk.f32.vlgmr.msra.gmra.mrb[14].mxu0 %vm448_vm9, %v1255_v12 }
 0x5dd   :  { %v1326_v33 = vpop.f32.mrb[14].mxu0 }
 0x5de   :  { %v1327_v35 = vadd.f32 %v1326_v33, %v1256_v23  ;;  %v1436_v24 = vpop.f32.mrb[15].mxu0 }
 0x5e0   :  { %1331 = vst.msk [vmem:[%s2556_s5] sm:$0xf] %vm1330_vm12, %v1327_v35 }

</bundles_post_ra>
